<compile_context>
chip_gen: v7x
topology: tpu7x:2x2x1
jax: 0.10.0
libtpu: 0.0.40
codegen_flags: <defaults>
</compile_context>

<pallas_src>
import jax
import jax.numpy as jnp
from jax.experimental import pallas as pl
from jax.experimental.pallas import tpu as pltpu

# ---- model hyper-parameters (small, consistent with the module) ----
B = 2
L = 8
HIDDEN = 32
HEADS = 4
D_K = HIDDEN // HEADS
REPR_IN = 53
REPR_PAD = 64          # REPR_IN zero-padded to an aligned width (pads are zeros -> free)
REPR_HID = 32
LN_EPS = 1e-5
# NEG plays the role of -inf: scores are O(1), so exp(NEG - rowmax) underflows to 0.0 in
# f32 and (NEG * 0.0) for fully-masked rows stays finite (no inf*0 NaN).
NEG = -1e30


def _softmax_rows(s):
    m = jnp.max(s, axis=-1, keepdims=True)
    e = jnp.exp(s - m)
    return e / jnp.sum(e, axis=-1, keepdims=True)


# ---------------------------------------------------------------------------
# Fused kernel: QKV projection + repr MLP + masked attention + out-proj + LayerNorm
# Single invocation (no grid): both batches handled in one body.
# ---------------------------------------------------------------------------
def _fused_attention_kernel(x_ref, rc_ref, bias_ref, rvalid_ref,
                            wqkv_ref, bqkv_ref, w1_ref, b1_ref,
                            w2r_ref, b2r_ref, u_ref, vt_ref,
                            wo_ref, bo_ref, g_ref, beta_ref, y_ref):
    x = x_ref[...]                                    # (B*L, H) = (16, 32)

    # ---- fused Q/K/V projection: one (16,32)@(32,96) matmul ----
    qkv = jnp.dot(x, wqkv_ref[...], preferred_element_type=jnp.float32) + bqkv_ref[...]
    q = qkv[:, 0:HIDDEN]
    k = qkv[:, HIDDEN:2 * HIDDEN]
    v = qkv[:, 2 * HIDDEN:3 * HIDDEN]

    # ---- repr MLP in the FLAT layout (no block-diagonal weights) ----
    # rc rows are indexed by r = b*L*L + i*L + j; columns are the padded 64-vector.
    rc = rc_ref[...]                                  # (B*L*L, 64) = (128, 64)
    h1 = jnp.dot(rc, w1_ref[...], preferred_element_type=jnp.float32) + b1_ref[...]
    h1 = jnp.maximum(h1, 0.0)                         # ReLU
    # w2r repeats each head column L times -> big[r, h*L + j'] = MLP(rc[r])[h].
    # Vt[r, h*L + j'] = (r % L == j') keeps only the j' == j entry of every row.
    big = (jnp.dot(h1, w2r_ref[...], preferred_element_type=jnp.float32)
           + b2r_ref[...]) * vt_ref[...]              # (128, 32)
    # U[p, r] = (r // L == p): one tiny matmul "unflattens" rows r=(b,i,j) into
    # rows p=(b,i) x lanes (h*L + j) -- no in-kernel reshape / transpose needed.
    rw = jnp.dot(u_ref[...], big, preferred_element_type=jnp.float32)   # (16, 32)

    bias = bias_ref[...]                              # (B*L, L) additive mask bias (0 / NEG)
    rvalid = rvalid_ref[...]                          # (B*L, 1) 1.0 iff row has a valid key
    inv_sqrt_dk = 1.0 / (D_K ** 0.5)

    ctx_rows = []
    for b in range(B):                                # unrolled: B = 2
        rs = slice(b * L, (b + 1) * L)
        bias_b = bias[rs, :]                          # (L, L)
        rv_b = rvalid[rs, :]                          # (L, 1)
        head_cols = []
        for h in range(HEADS):                        # unrolled: HEADS = 4
            cs = slice(h * D_K, (h + 1) * D_K)
            qh = q[rs, cs]
            kh = k[rs, cs]
            vh = v[rs, cs]
            # scores = qh @ kh^T / sqrt(d_k)
            s = jax.lax.dot_general(qh, kh, (((1,), (1,)), ((), ())),
                                    preferred_element_type=jnp.float32) * inv_sqrt_dk
            # invalid pairs -> NEG; fully-masked rows -> all zeros (=> uniform softmax)
            attn_w = _softmax_rows((s + bias_b) * rv_b)
            ref_w = _softmax_rows((rw[rs, h * L:(h + 1) * L] + bias_b) * rv_b)
            cw = attn_w + ref_w
            cw = cw / jnp.sum(cw, axis=-1, keepdims=True)   # exact renormalization
            head_cols.append(jnp.dot(cw, vh, preferred_element_type=jnp.float32))
        ctx_rows.append(jnp.concatenate(head_cols, axis=-1))     # (L, H) head-merged
    ctx = jnp.concatenate(ctx_rows, axis=0)                       # (B*L, H)

    # ---- output projection + residual + LayerNorm ----
    o = jnp.dot(ctx, wo_ref[...], preferred_element_type=jnp.float32) + bo_ref[...]
    y = x + o
    mu = jnp.mean(y, axis=-1, keepdims=True)
    var = jnp.mean((y - mu) ** 2, axis=-1, keepdims=True)
    yn = (y - mu) * jax.lax.rsqrt(var + LN_EPS)
    y_ref[...] = yn * g_ref[...] + beta_ref[...]


# ---------------------------------------------------------------------------
# Static weight packing -- done ONCE, outside the per-call jit.
# ---------------------------------------------------------------------------
def pack_params(p, batch=B, length=L):
    wqkv = jnp.concatenate([p["wq"], p["wk"], p["wv"]], axis=1)            # (H, 3H)
    bqkv = jnp.concatenate([p["bq"], p["bk"], p["bv"]], axis=1)            # (1, 3H)
    w1p = jnp.pad(p["w1"], ((0, REPR_PAD - REPR_IN), (0, 0)))              # (64, 32)
    w2r = jnp.repeat(p["w2"], length, axis=1)                              # (32, HEADS*L)
    b2r = jnp.repeat(p["b2"], length, axis=1)                              # (1, HEADS*L)
    r = jnp.arange(batch * length * length)
    pidx = jnp.arange(batch * length)
    c = jnp.arange(HEADS * length)
    U = (r[None, :] // length == pidx[:, None]).astype(jnp.float32)        # (B*L, B*L*L)
    Vt = ((r[:, None] % length) == (c[None, :] % length)).astype(jnp.float32)  # (B*L*L, HEADS*L)
    return {
        "wqkv": wqkv, "bqkv": bqkv,
        "w1p": w1p, "b1": p["b1"],
        "w2r": w2r, "b2r": b2r,
        "U": U, "Vt": Vt,
        "wo": p["wo"], "bo": p["bo"],
        "gamma": p["gamma"], "beta": p["beta"],
    }


# ---------------------------------------------------------------------------
# Per-call wrapper: only data prep (refCov pad+flatten, mask bias) + pallas_call
# ---------------------------------------------------------------------------
@jax.jit
def attention_block_pallas(x, mask, refCov, packed):
    Bx, Lx, Hx = x.shape
    x_flat = x.reshape(Bx * Lx, Hx)
    rc_flat = jnp.pad(refCov, ((0, 0), (0, 0), (0, 0), (0, REPR_PAD - REPR_IN)))
    rc_flat = rc_flat.reshape(Bx * Lx * Lx, REPR_PAD)

    m2 = mask[:, :, None] & mask[:, None, :]                               # (B, L, L)
    bias = jnp.where(m2, 0.0, NEG).astype(jnp.float32).reshape(Bx * Lx, Lx)
    rvalid = jnp.any(m2, axis=-1).astype(jnp.float32).reshape(Bx * Lx, 1)

    in_specs = [pl.BlockSpec(memory_space=pltpu.MemorySpace.VMEM) for _ in range(16)]
    y_flat = pl.pallas_call(
        _fused_attention_kernel,
        in_specs=in_specs,
        out_specs=pl.BlockSpec(memory_space=pltpu.MemorySpace.VMEM),
        out_shape=jax.ShapeDtypeStruct((Bx * Lx, Hx), jnp.float32),
    )(x_flat, rc_flat, bias, rvalid,
      packed["wqkv"], packed["bqkv"], packed["w1p"], packed["b1"],
      packed["w2r"], packed["b2r"], packed["U"], packed["Vt"],
      packed["wo"], packed["bo"], packed["gamma"], packed["beta"])
    return y_flat.reshape(Bx, Lx, Hx)


# ---------------------------------------------------------------------------
# Deterministic parameter init (shapes from AttentionBlock.__init__)
# ---------------------------------------------------------------------------
def init_params(key):
    ks = jax.random.split(key, 12)

    def w(k, shape, scale=0.1):
        return jax.random.normal(k, shape, dtype=jnp.float32) * scale

    return {
        "wq": w(ks[0], (HIDDEN, HIDDEN)), "bq": w(ks[1], (1, HIDDEN)),
        "wk": w(ks[2], (HIDDEN, HIDDEN)), "bk": w(ks[3], (1, HIDDEN)),
        "wv": w(ks[4], (HIDDEN, HIDDEN)), "bv": w(ks[5], (1, HIDDEN)),
        "wo": w(ks[6], (HIDDEN, HIDDEN)), "bo": w(ks[7], (1, HIDDEN)),
        "w1": w(ks[8], (REPR_IN, REPR_HID)), "b1": w(ks[9], (1, REPR_HID)),
        "w2": w(ks[10], (REPR_HID, HEADS)), "b2": w(ks[11], (1, HEADS)),
        "gamma": jnp.ones((1, HIDDEN), jnp.float32),
        "beta": jnp.zeros((1, HIDDEN), jnp.float32),
    }


# ---------------------------------------------------------------------------
# Pure-JAX reference (mirrors the PyTorch forward) for correctness check
# ---------------------------------------------------------------------------
def reference_forward(x, mask, refCov, p):
    Bx, Lx, Hx = x.shape
    dk = Hx // HEADS
    q = x @ p["wq"] + p["bq"]
    k = x @ p["wk"] + p["bk"]
    v = x @ p["wv"] + p["bv"]
    q = q.reshape(Bx, Lx, HEADS, dk).transpose(0, 2, 1, 3)
    k = k.reshape(Bx, Lx, HEADS, dk).transpose(0, 2, 1, 3)
    v = v.reshape(Bx, Lx, HEADS, dk).transpose(0, 2, 1, 3)
    scores = jnp.einsum("bhid,bhjd->bhij", q, k) / (dk ** 0.5)

    m2 = mask[:, :, None] & mask[:, None, :]          # (B, L, L)

    def mask_fn(t):
        t = jnp.where(m2[:, None, :, :], t, -jnp.inf)
        all_inf = jnp.all(t == -jnp.inf, axis=-1, keepdims=True)
        return jnp.where(all_inf, 0.0, t)

    attn = jax.nn.softmax(mask_fn(scores), axis=-1)

    h1 = jax.nn.relu(refCov @ p["w1"] + p["b1"])
    rw = (h1 @ p["w2"] + p["b2"]).transpose(0, 3, 1, 2)
    rw = jax.nn.softmax(mask_fn(rw), axis=-1)

    cw = attn + rw
    cw = cw / jnp.sum(cw, axis=-1, keepdims=True)
    out = jnp.einsum("bhij,bhjd->bhid", cw, v)
    out = out.transpose(0, 2, 1, 3).reshape(Bx, Lx, Hx)
    out = out @ p["wo"] + p["bo"]
    y = x + out
    mu = y.mean(-1, keepdims=True)
    var = ((y - mu) ** 2).mean(-1, keepdims=True)
    return (y - mu) / jnp.sqrt(var + LN_EPS) * p["gamma"] + p["beta"]


if __name__ == "__main__":
    key = jax.random.PRNGKey(0)
    kx, kr = jax.random.split(key, 2)
    x = jax.random.normal(kx, (B, L, HIDDEN), dtype=jnp.float32)
    refCov = jax.random.normal(kr, (B, L, L, REPR_IN), dtype=jnp.float32)
    # batch 0 has two masked (padding) positions; batch 1 is fully valid
    mask = jnp.array([[1, 1, 1, 1, 1, 1, 0, 0],
                      [1, 1, 1, 1, 1, 1, 1, 1]], dtype=bool)
    params = init_params(jax.random.PRNGKey(1))
    packed = pack_params(params)            # static packing, once (not per forward call)

    out = attention_block_pallas(x, mask, refCov, packed)
    out = jax.block_until_ready(out)

    ref = reference_forward(x, mask, refCov, params)
    assert bool(jnp.all(jnp.isfinite(out)))
    err = float(jnp.max(jnp.abs(out - ref)))
    assert bool(jnp.allclose(out, ref, atol=2e-2, rtol=2e-2)), err

    print("KERNEL_OK")
</pallas_src>

<mosaic_0001>
module attributes {stable_mosaic.version = 11 : i64} {
  func.func @_fused_attention_kernel(%arg0: memref<16x32xf32, #tpu.memory_space<vmem>>, %arg1: memref<128x64xf32, #tpu.memory_space<vmem>>, %arg2: memref<16x8xf32, #tpu.memory_space<vmem>>, %arg3: memref<16x1xf32, #tpu.memory_space<vmem>>, %arg4: memref<32x96xf32, #tpu.memory_space<vmem>>, %arg5: memref<1x96xf32, #tpu.memory_space<vmem>>, %arg6: memref<64x32xf32, #tpu.memory_space<vmem>>, %arg7: memref<1x32xf32, #tpu.memory_space<vmem>>, %arg8: memref<32x32xf32, #tpu.memory_space<vmem>>, %arg9: memref<1x32xf32, #tpu.memory_space<vmem>>, %arg10: memref<16x128xf32, #tpu.memory_space<vmem>>, %arg11: memref<128x32xf32, #tpu.memory_space<vmem>>, %arg12: memref<32x32xf32, #tpu.memory_space<vmem>>, %arg13: memref<1x32xf32, #tpu.memory_space<vmem>>, %arg14: memref<1x32xf32, #tpu.memory_space<vmem>>, %arg15: memref<1x32xf32, #tpu.memory_space<vmem>>, %arg16: memref<16x32xf32, #tpu.memory_space<vmem>>) attributes {dimension_semantics = [], scalar_prefetch = 0 : i64, scratch_operands = 0 : i64, tpu.core_type = #tpu.core_type<tc>} {
    %c0 = arith.constant 0 : index
    %c0_0 = arith.constant 0 : index
    %0 = vector.load %arg0[%c0, %c0_0] : memref<16x32xf32, #tpu.memory_space<vmem>>, vector<16x32xf32>
    %c0_1 = arith.constant 0 : index
    %c0_2 = arith.constant 0 : index
    %1 = vector.load %arg4[%c0_1, %c0_2] : memref<32x96xf32, #tpu.memory_space<vmem>>, vector<32x96xf32>
    %cst = arith.constant dense<0.000000e+00> : vector<16x96xf32>
    %2 = tpu.matmul %0, %1, %cst {dimension_numbers = #tpu.dot_dimension_numbers<[1], [0], [0], [1], [0, 0, 1, 1], [], []>} : vector<16x32xf32>, vector<32x96xf32>, vector<16x96xf32> -> vector<16x96xf32>
    %c0_3 = arith.constant 0 : index
    %c0_4 = arith.constant 0 : index
    %3 = vector.load %arg5[%c0_3, %c0_4] : memref<1x96xf32, #tpu.memory_space<vmem>>, vector<1x96xf32>
    %4 = vector.broadcast %3 : vector<1x96xf32> to vector<16x96xf32>
    %5 = arith.addf %2, %4 : vector<16x96xf32>
    %6 = vector.extract_strided_slice %5 {offsets = [0, 0], sizes = [16, 32], strides = [1, 1]} : vector<16x96xf32> to vector<16x32xf32>
    %7 = vector.extract_strided_slice %5 {offsets = [0, 32], sizes = [16, 32], strides = [1, 1]} : vector<16x96xf32> to vector<16x32xf32>
    %8 = vector.extract_strided_slice %5 {offsets = [0, 64], sizes = [16, 32], strides = [1, 1]} : vector<16x96xf32> to vector<16x32xf32>
    %c0_5 = arith.constant 0 : index
    %c0_6 = arith.constant 0 : index
    %9 = vector.load %arg1[%c0_5, %c0_6] : memref<128x64xf32, #tpu.memory_space<vmem>>, vector<128x64xf32>
    %c0_7 = arith.constant 0 : index
    %c0_8 = arith.constant 0 : index
    %10 = vector.load %arg6[%c0_7, %c0_8] : memref<64x32xf32, #tpu.memory_space<vmem>>, vector<64x32xf32>
    %cst_9 = arith.constant dense<0.000000e+00> : vector<128x32xf32>
    %11 = tpu.matmul %9, %10, %cst_9 {dimension_numbers = #tpu.dot_dimension_numbers<[1], [0], [0], [1], [0, 0, 1, 1], [], []>} : vector<128x64xf32>, vector<64x32xf32>, vector<128x32xf32> -> vector<128x32xf32>
    %c0_10 = arith.constant 0 : index
    %c0_11 = arith.constant 0 : index
    %12 = vector.load %arg7[%c0_10, %c0_11] : memref<1x32xf32, #tpu.memory_space<vmem>>, vector<1x32xf32>
    %13 = vector.broadcast %12 : vector<1x32xf32> to vector<128x32xf32>
    %14 = arith.addf %11, %13 : vector<128x32xf32>
    %cst_12 = arith.constant 0.000000e+00 : f32
    %15 = vector.broadcast %cst_12 : f32 to vector<128x32xf32>
    %16 = arith.maximumf %14, %15 : vector<128x32xf32>
    %c0_13 = arith.constant 0 : index
    %c0_14 = arith.constant 0 : index
    %17 = vector.load %arg8[%c0_13, %c0_14] : memref<32x32xf32, #tpu.memory_space<vmem>>, vector<32x32xf32>
    %cst_15 = arith.constant dense<0.000000e+00> : vector<128x32xf32>
    %18 = tpu.matmul %16, %17, %cst_15 {dimension_numbers = #tpu.dot_dimension_numbers<[1], [0], [0], [1], [0, 0, 1, 1], [], []>} : vector<128x32xf32>, vector<32x32xf32>, vector<128x32xf32> -> vector<128x32xf32>
    %c0_16 = arith.constant 0 : index
    %c0_17 = arith.constant 0 : index
    %19 = vector.load %arg9[%c0_16, %c0_17] : memref<1x32xf32, #tpu.memory_space<vmem>>, vector<1x32xf32>
    %20 = vector.broadcast %19 : vector<1x32xf32> to vector<128x32xf32>
    %21 = arith.addf %18, %20 : vector<128x32xf32>
    %c0_18 = arith.constant 0 : index
    %c0_19 = arith.constant 0 : index
    %22 = vector.load %arg11[%c0_18, %c0_19] : memref<128x32xf32, #tpu.memory_space<vmem>>, vector<128x32xf32>
    %23 = arith.mulf %21, %22 : vector<128x32xf32>
    %c0_20 = arith.constant 0 : index
    %c0_21 = arith.constant 0 : index
    %24 = vector.load %arg10[%c0_20, %c0_21] : memref<16x128xf32, #tpu.memory_space<vmem>>, vector<16x128xf32>
    %cst_22 = arith.constant dense<0.000000e+00> : vector<16x32xf32>
    %25 = tpu.matmul %24, %23, %cst_22 {dimension_numbers = #tpu.dot_dimension_numbers<[1], [0], [0], [1], [0, 0, 1, 1], [], []>} : vector<16x128xf32>, vector<128x32xf32>, vector<16x32xf32> -> vector<16x32xf32>
    %c0_23 = arith.constant 0 : index
    %c0_24 = arith.constant 0 : index
    %26 = vector.load %arg2[%c0_23, %c0_24] : memref<16x8xf32, #tpu.memory_space<vmem>>, vector<16x8xf32>
    %c0_25 = arith.constant 0 : index
    %c0_26 = arith.constant 0 : index
    %27 = vector.load %arg3[%c0_25, %c0_26] : memref<16x1xf32, #tpu.memory_space<vmem>>, vector<16x1xf32>
    %28 = vector.extract_strided_slice %26 {offsets = [0, 0], sizes = [8, 8], strides = [1, 1]} : vector<16x8xf32> to vector<8x8xf32>
    %29 = vector.extract_strided_slice %27 {offsets = [0, 0], sizes = [8, 1], strides = [1, 1]} : vector<16x1xf32> to vector<8x1xf32>
    %30 = vector.extract_strided_slice %6 {offsets = [0, 0], sizes = [8, 8], strides = [1, 1]} : vector<16x32xf32> to vector<8x8xf32>
    %31 = vector.extract_strided_slice %7 {offsets = [0, 0], sizes = [8, 8], strides = [1, 1]} : vector<16x32xf32> to vector<8x8xf32>
    %32 = vector.extract_strided_slice %8 {offsets = [0, 0], sizes = [8, 8], strides = [1, 1]} : vector<16x32xf32> to vector<8x8xf32>
    %cst_27 = arith.constant dense<0.000000e+00> : vector<8x8xf32>
    %33 = tpu.matmul %30, %31, %cst_27 {dimension_numbers = #tpu.dot_dimension_numbers<[1], [1], [0], [0], [0, 0, 1, 0], [], []>} : vector<8x8xf32>, vector<8x8xf32>, vector<8x8xf32> -> vector<8x8xf32>
    %cst_28 = arith.constant 0.353553385 : f32
    %34 = vector.broadcast %cst_28 : f32 to vector<8x8xf32>
    %35 = arith.mulf %33, %34 : vector<8x8xf32>
    %36 = arith.addf %35, %28 : vector<8x8xf32>
    %37 = vector.broadcast %29 : vector<8x1xf32> to vector<8x8xf32>
    %38 = arith.mulf %36, %37 : vector<8x8xf32>
    %cst_29 = arith.constant dense<0xFF800000> : vector<8xf32>
    %39 = vector.multi_reduction <maximumf>, %38, %cst_29 [1] : vector<8x8xf32> to vector<8xf32>
    %40 = vector.shape_cast %39 : vector<8xf32> to vector<8x1xf32>
    %41 = vector.broadcast %40 : vector<8x1xf32> to vector<8x8xf32>
    %42 = arith.subf %38, %41 : vector<8x8xf32>
    %43 = math.exp %42 : vector<8x8xf32>
    %cst_30 = arith.constant dense<0.000000e+00> : vector<8xf32>
    %44 = vector.multi_reduction <add>, %43, %cst_30 [1] : vector<8x8xf32> to vector<8xf32>
    %45 = vector.shape_cast %44 : vector<8xf32> to vector<8x1xf32>
    %46 = vector.broadcast %45 : vector<8x1xf32> to vector<8x8xf32>
    %47 = arith.divf %43, %46 : vector<8x8xf32>
    %48 = vector.extract_strided_slice %25 {offsets = [0, 0], sizes = [8, 8], strides = [1, 1]} : vector<16x32xf32> to vector<8x8xf32>
    %49 = arith.addf %48, %28 : vector<8x8xf32>
    %50 = vector.broadcast %29 : vector<8x1xf32> to vector<8x8xf32>
    %51 = arith.mulf %49, %50 : vector<8x8xf32>
    %cst_31 = arith.constant dense<0xFF800000> : vector<8xf32>
    %52 = vector.multi_reduction <maximumf>, %51, %cst_31 [1] : vector<8x8xf32> to vector<8xf32>
    %53 = vector.shape_cast %52 : vector<8xf32> to vector<8x1xf32>
    %54 = vector.broadcast %53 : vector<8x1xf32> to vector<8x8xf32>
    %55 = arith.subf %51, %54 : vector<8x8xf32>
    %56 = math.exp %55 : vector<8x8xf32>
    %cst_32 = arith.constant dense<0.000000e+00> : vector<8xf32>
    %57 = vector.multi_reduction <add>, %56, %cst_32 [1] : vector<8x8xf32> to vector<8xf32>
    %58 = vector.shape_cast %57 : vector<8xf32> to vector<8x1xf32>
    %59 = vector.broadcast %58 : vector<8x1xf32> to vector<8x8xf32>
    %60 = arith.divf %56, %59 : vector<8x8xf32>
    %61 = arith.addf %47, %60 : vector<8x8xf32>
    %cst_33 = arith.constant dense<0.000000e+00> : vector<8xf32>
    %62 = vector.multi_reduction <add>, %61, %cst_33 [1] : vector<8x8xf32> to vector<8xf32>
    %63 = vector.shape_cast %62 : vector<8xf32> to vector<8x1xf32>
    %64 = vector.broadcast %63 : vector<8x1xf32> to vector<8x8xf32>
    %65 = arith.divf %61, %64 : vector<8x8xf32>
    %cst_34 = arith.constant dense<0.000000e+00> : vector<8x8xf32>
    %66 = tpu.matmul %65, %32, %cst_34 {dimension_numbers = #tpu.dot_dimension_numbers<[1], [0], [0], [1], [0, 0, 1, 1], [], []>} : vector<8x8xf32>, vector<8x8xf32>, vector<8x8xf32> -> vector<8x8xf32>
    %67 = vector.extract_strided_slice %6 {offsets = [0, 8], sizes = [8, 8], strides = [1, 1]} : vector<16x32xf32> to vector<8x8xf32>
    %68 = vector.extract_strided_slice %7 {offsets = [0, 8], sizes = [8, 8], strides = [1, 1]} : vector<16x32xf32> to vector<8x8xf32>
    %69 = vector.extract_strided_slice %8 {offsets = [0, 8], sizes = [8, 8], strides = [1, 1]} : vector<16x32xf32> to vector<8x8xf32>
    %cst_35 = arith.constant dense<0.000000e+00> : vector<8x8xf32>
    %70 = tpu.matmul %67, %68, %cst_35 {dimension_numbers = #tpu.dot_dimension_numbers<[1], [1], [0], [0], [0, 0, 1, 0], [], []>} : vector<8x8xf32>, vector<8x8xf32>, vector<8x8xf32> -> vector<8x8xf32>
    %cst_36 = arith.constant 0.353553385 : f32
    %71 = vector.broadcast %cst_36 : f32 to vector<8x8xf32>
    %72 = arith.mulf %70, %71 : vector<8x8xf32>
    %73 = arith.addf %72, %28 : vector<8x8xf32>
    %74 = vector.broadcast %29 : vector<8x1xf32> to vector<8x8xf32>
    %75 = arith.mulf %73, %74 : vector<8x8xf32>
    %cst_37 = arith.constant dense<0xFF800000> : vector<8xf32>
    %76 = vector.multi_reduction <maximumf>, %75, %cst_37 [1] : vector<8x8xf32> to vector<8xf32>
    %77 = vector.shape_cast %76 : vector<8xf32> to vector<8x1xf32>
    %78 = vector.broadcast %77 : vector<8x1xf32> to vector<8x8xf32>
    %79 = arith.subf %75, %78 : vector<8x8xf32>
    %80 = math.exp %79 : vector<8x8xf32>
    %cst_38 = arith.constant dense<0.000000e+00> : vector<8xf32>
    %81 = vector.multi_reduction <add>, %80, %cst_38 [1] : vector<8x8xf32> to vector<8xf32>
    %82 = vector.shape_cast %81 : vector<8xf32> to vector<8x1xf32>
    %83 = vector.broadcast %82 : vector<8x1xf32> to vector<8x8xf32>
    %84 = arith.divf %80, %83 : vector<8x8xf32>
    %85 = vector.extract_strided_slice %25 {offsets = [0, 8], sizes = [8, 8], strides = [1, 1]} : vector<16x32xf32> to vector<8x8xf32>
    %86 = arith.addf %85, %28 : vector<8x8xf32>
    %87 = vector.broadcast %29 : vector<8x1xf32> to vector<8x8xf32>
    %88 = arith.mulf %86, %87 : vector<8x8xf32>
    %cst_39 = arith.constant dense<0xFF800000> : vector<8xf32>
    %89 = vector.multi_reduction <maximumf>, %88, %cst_39 [1] : vector<8x8xf32> to vector<8xf32>
    %90 = vector.shape_cast %89 : vector<8xf32> to vector<8x1xf32>
    %91 = vector.broadcast %90 : vector<8x1xf32> to vector<8x8xf32>
    %92 = arith.subf %88, %91 : vector<8x8xf32>
    %93 = math.exp %92 : vector<8x8xf32>
    %cst_40 = arith.constant dense<0.000000e+00> : vector<8xf32>
    %94 = vector.multi_reduction <add>, %93, %cst_40 [1] : vector<8x8xf32> to vector<8xf32>
    %95 = vector.shape_cast %94 : vector<8xf32> to vector<8x1xf32>
    %96 = vector.broadcast %95 : vector<8x1xf32> to vector<8x8xf32>
    %97 = arith.divf %93, %96 : vector<8x8xf32>
    %98 = arith.addf %84, %97 : vector<8x8xf32>
    %cst_41 = arith.constant dense<0.000000e+00> : vector<8xf32>
    %99 = vector.multi_reduction <add>, %98, %cst_41 [1] : vector<8x8xf32> to vector<8xf32>
    %100 = vector.shape_cast %99 : vector<8xf32> to vector<8x1xf32>
    %101 = vector.broadcast %100 : vector<8x1xf32> to vector<8x8xf32>
    %102 = arith.divf %98, %101 : vector<8x8xf32>
    %cst_42 = arith.constant dense<0.000000e+00> : vector<8x8xf32>
    %103 = tpu.matmul %102, %69, %cst_42 {dimension_numbers = #tpu.dot_dimension_numbers<[1], [0], [0], [1], [0, 0, 1, 1], [], []>} : vector<8x8xf32>, vector<8x8xf32>, vector<8x8xf32> -> vector<8x8xf32>
    %104 = vector.extract_strided_slice %6 {offsets = [0, 16], sizes = [8, 8], strides = [1, 1]} : vector<16x32xf32> to vector<8x8xf32>
    %105 = vector.extract_strided_slice %7 {offsets = [0, 16], sizes = [8, 8], strides = [1, 1]} : vector<16x32xf32> to vector<8x8xf32>
    %106 = vector.extract_strided_slice %8 {offsets = [0, 16], sizes = [8, 8], strides = [1, 1]} : vector<16x32xf32> to vector<8x8xf32>
    %cst_43 = arith.constant dense<0.000000e+00> : vector<8x8xf32>
    %107 = tpu.matmul %104, %105, %cst_43 {dimension_numbers = #tpu.dot_dimension_numbers<[1], [1], [0], [0], [0, 0, 1, 0], [], []>} : vector<8x8xf32>, vector<8x8xf32>, vector<8x8xf32> -> vector<8x8xf32>
    %cst_44 = arith.constant 0.353553385 : f32
    %108 = vector.broadcast %cst_44 : f32 to vector<8x8xf32>
    %109 = arith.mulf %107, %108 : vector<8x8xf32>
    %110 = arith.addf %109, %28 : vector<8x8xf32>
    %111 = vector.broadcast %29 : vector<8x1xf32> to vector<8x8xf32>
    %112 = arith.mulf %110, %111 : vector<8x8xf32>
    %cst_45 = arith.constant dense<0xFF800000> : vector<8xf32>
    %113 = vector.multi_reduction <maximumf>, %112, %cst_45 [1] : vector<8x8xf32> to vector<8xf32>
    %114 = vector.shape_cast %113 : vector<8xf32> to vector<8x1xf32>
    %115 = vector.broadcast %114 : vector<8x1xf32> to vector<8x8xf32>
    %116 = arith.subf %112, %115 : vector<8x8xf32>
    %117 = math.exp %116 : vector<8x8xf32>
    %cst_46 = arith.constant dense<0.000000e+00> : vector<8xf32>
    %118 = vector.multi_reduction <add>, %117, %cst_46 [1] : vector<8x8xf32> to vector<8xf32>
    %119 = vector.shape_cast %118 : vector<8xf32> to vector<8x1xf32>
    %120 = vector.broadcast %119 : vector<8x1xf32> to vector<8x8xf32>
    %121 = arith.divf %117, %120 : vector<8x8xf32>
    %122 = vector.extract_strided_slice %25 {offsets = [0, 16], sizes = [8, 8], strides = [1, 1]} : vector<16x32xf32> to vector<8x8xf32>
    %123 = arith.addf %122, %28 : vector<8x8xf32>
    %124 = vector.broadcast %29 : vector<8x1xf32> to vector<8x8xf32>
    %125 = arith.mulf %123, %124 : vector<8x8xf32>
    %cst_47 = arith.constant dense<0xFF800000> : vector<8xf32>
    %126 = vector.multi_reduction <maximumf>, %125, %cst_47 [1] : vector<8x8xf32> to vector<8xf32>
    %127 = vector.shape_cast %126 : vector<8xf32> to vector<8x1xf32>
    %128 = vector.broadcast %127 : vector<8x1xf32> to vector<8x8xf32>
    %129 = arith.subf %125, %128 : vector<8x8xf32>
    %130 = math.exp %129 : vector<8x8xf32>
    %cst_48 = arith.constant dense<0.000000e+00> : vector<8xf32>
    %131 = vector.multi_reduction <add>, %130, %cst_48 [1] : vector<8x8xf32> to vector<8xf32>
    %132 = vector.shape_cast %131 : vector<8xf32> to vector<8x1xf32>
    %133 = vector.broadcast %132 : vector<8x1xf32> to vector<8x8xf32>
    %134 = arith.divf %130, %133 : vector<8x8xf32>
    %135 = arith.addf %121, %134 : vector<8x8xf32>
    %cst_49 = arith.constant dense<0.000000e+00> : vector<8xf32>
    %136 = vector.multi_reduction <add>, %135, %cst_49 [1] : vector<8x8xf32> to vector<8xf32>
    %137 = vector.shape_cast %136 : vector<8xf32> to vector<8x1xf32>
    %138 = vector.broadcast %137 : vector<8x1xf32> to vector<8x8xf32>
    %139 = arith.divf %135, %138 : vector<8x8xf32>
    %cst_50 = arith.constant dense<0.000000e+00> : vector<8x8xf32>
    %140 = tpu.matmul %139, %106, %cst_50 {dimension_numbers = #tpu.dot_dimension_numbers<[1], [0], [0], [1], [0, 0, 1, 1], [], []>} : vector<8x8xf32>, vector<8x8xf32>, vector<8x8xf32> -> vector<8x8xf32>
    %141 = vector.extract_strided_slice %6 {offsets = [0, 24], sizes = [8, 8], strides = [1, 1]} : vector<16x32xf32> to vector<8x8xf32>
    %142 = vector.extract_strided_slice %7 {offsets = [0, 24], sizes = [8, 8], strides = [1, 1]} : vector<16x32xf32> to vector<8x8xf32>
    %143 = vector.extract_strided_slice %8 {offsets = [0, 24], sizes = [8, 8], strides = [1, 1]} : vector<16x32xf32> to vector<8x8xf32>
    %cst_51 = arith.constant dense<0.000000e+00> : vector<8x8xf32>
    %144 = tpu.matmul %141, %142, %cst_51 {dimension_numbers = #tpu.dot_dimension_numbers<[1], [1], [0], [0], [0, 0, 1, 0], [], []>} : vector<8x8xf32>, vector<8x8xf32>, vector<8x8xf32> -> vector<8x8xf32>
    %cst_52 = arith.constant 0.353553385 : f32
    %145 = vector.broadcast %cst_52 : f32 to vector<8x8xf32>
    %146 = arith.mulf %144, %145 : vector<8x8xf32>
    %147 = arith.addf %146, %28 : vector<8x8xf32>
    %148 = vector.broadcast %29 : vector<8x1xf32> to vector<8x8xf32>
    %149 = arith.mulf %147, %148 : vector<8x8xf32>
    %cst_53 = arith.constant dense<0xFF800000> : vector<8xf32>
    %150 = vector.multi_reduction <maximumf>, %149, %cst_53 [1] : vector<8x8xf32> to vector<8xf32>
    %151 = vector.shape_cast %150 : vector<8xf32> to vector<8x1xf32>
    %152 = vector.broadcast %151 : vector<8x1xf32> to vector<8x8xf32>
    %153 = arith.subf %149, %152 : vector<8x8xf32>
    %154 = math.exp %153 : vector<8x8xf32>
    %cst_54 = arith.constant dense<0.000000e+00> : vector<8xf32>
    %155 = vector.multi_reduction <add>, %154, %cst_54 [1] : vector<8x8xf32> to vector<8xf32>
    %156 = vector.shape_cast %155 : vector<8xf32> to vector<8x1xf32>
    %157 = vector.broadcast %156 : vector<8x1xf32> to vector<8x8xf32>
    %158 = arith.divf %154, %157 : vector<8x8xf32>
    %159 = vector.extract_strided_slice %25 {offsets = [0, 24], sizes = [8, 8], strides = [1, 1]} : vector<16x32xf32> to vector<8x8xf32>
    %160 = arith.addf %159, %28 : vector<8x8xf32>
    %161 = vector.broadcast %29 : vector<8x1xf32> to vector<8x8xf32>
    %162 = arith.mulf %160, %161 : vector<8x8xf32>
    %cst_55 = arith.constant dense<0xFF800000> : vector<8xf32>
    %163 = vector.multi_reduction <maximumf>, %162, %cst_55 [1] : vector<8x8xf32> to vector<8xf32>
    %164 = vector.shape_cast %163 : vector<8xf32> to vector<8x1xf32>
    %165 = vector.broadcast %164 : vector<8x1xf32> to vector<8x8xf32>
    %166 = arith.subf %162, %165 : vector<8x8xf32>
    %167 = math.exp %166 : vector<8x8xf32>
    %cst_56 = arith.constant dense<0.000000e+00> : vector<8xf32>
    %168 = vector.multi_reduction <add>, %167, %cst_56 [1] : vector<8x8xf32> to vector<8xf32>
    %169 = vector.shape_cast %168 : vector<8xf32> to vector<8x1xf32>
    %170 = vector.broadcast %169 : vector<8x1xf32> to vector<8x8xf32>
    %171 = arith.divf %167, %170 : vector<8x8xf32>
    %172 = arith.addf %158, %171 : vector<8x8xf32>
    %cst_57 = arith.constant dense<0.000000e+00> : vector<8xf32>
    %173 = vector.multi_reduction <add>, %172, %cst_57 [1] : vector<8x8xf32> to vector<8xf32>
    %174 = vector.shape_cast %173 : vector<8xf32> to vector<8x1xf32>
    %175 = vector.broadcast %174 : vector<8x1xf32> to vector<8x8xf32>
    %176 = arith.divf %172, %175 : vector<8x8xf32>
    %cst_58 = arith.constant dense<0.000000e+00> : vector<8x8xf32>
    %177 = tpu.matmul %176, %143, %cst_58 {dimension_numbers = #tpu.dot_dimension_numbers<[1], [0], [0], [1], [0, 0, 1, 1], [], []>} : vector<8x8xf32>, vector<8x8xf32>, vector<8x8xf32> -> vector<8x8xf32>
    %178 = tpu.concatenate %66, %103, %140, %177 in 1 : vector<8x8xf32>, vector<8x8xf32>, vector<8x8xf32>, vector<8x8xf32> -> vector<8x32xf32>
    %179 = vector.extract_strided_slice %26 {offsets = [8, 0], sizes = [8, 8], strides = [1, 1]} : vector<16x8xf32> to vector<8x8xf32>
    %180 = vector.extract_strided_slice %27 {offsets = [8, 0], sizes = [8, 1], strides = [1, 1]} : vector<16x1xf32> to vector<8x1xf32>
    %181 = vector.extract_strided_slice %6 {offsets = [8, 0], sizes = [8, 8], strides = [1, 1]} : vector<16x32xf32> to vector<8x8xf32>
    %182 = vector.extract_strided_slice %7 {offsets = [8, 0], sizes = [8, 8], strides = [1, 1]} : vector<16x32xf32> to vector<8x8xf32>
    %183 = vector.extract_strided_slice %8 {offsets = [8, 0], sizes = [8, 8], strides = [1, 1]} : vector<16x32xf32> to vector<8x8xf32>
    %cst_59 = arith.constant dense<0.000000e+00> : vector<8x8xf32>
    %184 = tpu.matmul %181, %182, %cst_59 {dimension_numbers = #tpu.dot_dimension_numbers<[1], [1], [0], [0], [0, 0, 1, 0], [], []>} : vector<8x8xf32>, vector<8x8xf32>, vector<8x8xf32> -> vector<8x8xf32>
    %cst_60 = arith.constant 0.353553385 : f32
    %185 = vector.broadcast %cst_60 : f32 to vector<8x8xf32>
    %186 = arith.mulf %184, %185 : vector<8x8xf32>
    %187 = arith.addf %186, %179 : vector<8x8xf32>
    %188 = vector.broadcast %180 : vector<8x1xf32> to vector<8x8xf32>
    %189 = arith.mulf %187, %188 : vector<8x8xf32>
    %cst_61 = arith.constant dense<0xFF800000> : vector<8xf32>
    %190 = vector.multi_reduction <maximumf>, %189, %cst_61 [1] : vector<8x8xf32> to vector<8xf32>
    %191 = vector.shape_cast %190 : vector<8xf32> to vector<8x1xf32>
    %192 = vector.broadcast %191 : vector<8x1xf32> to vector<8x8xf32>
    %193 = arith.subf %189, %192 : vector<8x8xf32>
    %194 = math.exp %193 : vector<8x8xf32>
    %cst_62 = arith.constant dense<0.000000e+00> : vector<8xf32>
    %195 = vector.multi_reduction <add>, %194, %cst_62 [1] : vector<8x8xf32> to vector<8xf32>
    %196 = vector.shape_cast %195 : vector<8xf32> to vector<8x1xf32>
    %197 = vector.broadcast %196 : vector<8x1xf32> to vector<8x8xf32>
    %198 = arith.divf %194, %197 : vector<8x8xf32>
    %199 = vector.extract_strided_slice %25 {offsets = [8, 0], sizes = [8, 8], strides = [1, 1]} : vector<16x32xf32> to vector<8x8xf32>
    %200 = arith.addf %199, %179 : vector<8x8xf32>
    %201 = vector.broadcast %180 : vector<8x1xf32> to vector<8x8xf32>
    %202 = arith.mulf %200, %201 : vector<8x8xf32>
    %cst_63 = arith.constant dense<0xFF800000> : vector<8xf32>
    %203 = vector.multi_reduction <maximumf>, %202, %cst_63 [1] : vector<8x8xf32> to vector<8xf32>
    %204 = vector.shape_cast %203 : vector<8xf32> to vector<8x1xf32>
    %205 = vector.broadcast %204 : vector<8x1xf32> to vector<8x8xf32>
    %206 = arith.subf %202, %205 : vector<8x8xf32>
    %207 = math.exp %206 : vector<8x8xf32>
    %cst_64 = arith.constant dense<0.000000e+00> : vector<8xf32>
    %208 = vector.multi_reduction <add>, %207, %cst_64 [1] : vector<8x8xf32> to vector<8xf32>
    %209 = vector.shape_cast %208 : vector<8xf32> to vector<8x1xf32>
    %210 = vector.broadcast %209 : vector<8x1xf32> to vector<8x8xf32>
    %211 = arith.divf %207, %210 : vector<8x8xf32>
    %212 = arith.addf %198, %211 : vector<8x8xf32>
    %cst_65 = arith.constant dense<0.000000e+00> : vector<8xf32>
    %213 = vector.multi_reduction <add>, %212, %cst_65 [1] : vector<8x8xf32> to vector<8xf32>
    %214 = vector.shape_cast %213 : vector<8xf32> to vector<8x1xf32>
    %215 = vector.broadcast %214 : vector<8x1xf32> to vector<8x8xf32>
    %216 = arith.divf %212, %215 : vector<8x8xf32>
    %cst_66 = arith.constant dense<0.000000e+00> : vector<8x8xf32>
    %217 = tpu.matmul %216, %183, %cst_66 {dimension_numbers = #tpu.dot_dimension_numbers<[1], [0], [0], [1], [0, 0, 1, 1], [], []>} : vector<8x8xf32>, vector<8x8xf32>, vector<8x8xf32> -> vector<8x8xf32>
    %218 = vector.extract_strided_slice %6 {offsets = [8, 8], sizes = [8, 8], strides = [1, 1]} : vector<16x32xf32> to vector<8x8xf32>
    %219 = vector.extract_strided_slice %7 {offsets = [8, 8], sizes = [8, 8], strides = [1, 1]} : vector<16x32xf32> to vector<8x8xf32>
    %220 = vector.extract_strided_slice %8 {offsets = [8, 8], sizes = [8, 8], strides = [1, 1]} : vector<16x32xf32> to vector<8x8xf32>
    %cst_67 = arith.constant dense<0.000000e+00> : vector<8x8xf32>
    %221 = tpu.matmul %218, %219, %cst_67 {dimension_numbers = #tpu.dot_dimension_numbers<[1], [1], [0], [0], [0, 0, 1, 0], [], []>} : vector<8x8xf32>, vector<8x8xf32>, vector<8x8xf32> -> vector<8x8xf32>
    %cst_68 = arith.constant 0.353553385 : f32
    %222 = vector.broadcast %cst_68 : f32 to vector<8x8xf32>
    %223 = arith.mulf %221, %222 : vector<8x8xf32>
    %224 = arith.addf %223, %179 : vector<8x8xf32>
    %225 = vector.broadcast %180 : vector<8x1xf32> to vector<8x8xf32>
    %226 = arith.mulf %224, %225 : vector<8x8xf32>
    %cst_69 = arith.constant dense<0xFF800000> : vector<8xf32>
    %227 = vector.multi_reduction <maximumf>, %226, %cst_69 [1] : vector<8x8xf32> to vector<8xf32>
    %228 = vector.shape_cast %227 : vector<8xf32> to vector<8x1xf32>
    %229 = vector.broadcast %228 : vector<8x1xf32> to vector<8x8xf32>
    %230 = arith.subf %226, %229 : vector<8x8xf32>
    %231 = math.exp %230 : vector<8x8xf32>
    %cst_70 = arith.constant dense<0.000000e+00> : vector<8xf32>
    %232 = vector.multi_reduction <add>, %231, %cst_70 [1] : vector<8x8xf32> to vector<8xf32>
    %233 = vector.shape_cast %232 : vector<8xf32> to vector<8x1xf32>
    %234 = vector.broadcast %233 : vector<8x1xf32> to vector<8x8xf32>
    %235 = arith.divf %231, %234 : vector<8x8xf32>
    %236 = vector.extract_strided_slice %25 {offsets = [8, 8], sizes = [8, 8], strides = [1, 1]} : vector<16x32xf32> to vector<8x8xf32>
    %237 = arith.addf %236, %179 : vector<8x8xf32>
    %238 = vector.broadcast %180 : vector<8x1xf32> to vector<8x8xf32>
    %239 = arith.mulf %237, %238 : vector<8x8xf32>
    %cst_71 = arith.constant dense<0xFF800000> : vector<8xf32>
    %240 = vector.multi_reduction <maximumf>, %239, %cst_71 [1] : vector<8x8xf32> to vector<8xf32>
    %241 = vector.shape_cast %240 : vector<8xf32> to vector<8x1xf32>
    %242 = vector.broadcast %241 : vector<8x1xf32> to vector<8x8xf32>
    %243 = arith.subf %239, %242 : vector<8x8xf32>
    %244 = math.exp %243 : vector<8x8xf32>
    %cst_72 = arith.constant dense<0.000000e+00> : vector<8xf32>
    %245 = vector.multi_reduction <add>, %244, %cst_72 [1] : vector<8x8xf32> to vector<8xf32>
    %246 = vector.shape_cast %245 : vector<8xf32> to vector<8x1xf32>
    %247 = vector.broadcast %246 : vector<8x1xf32> to vector<8x8xf32>
    %248 = arith.divf %244, %247 : vector<8x8xf32>
    %249 = arith.addf %235, %248 : vector<8x8xf32>
    %cst_73 = arith.constant dense<0.000000e+00> : vector<8xf32>
    %250 = vector.multi_reduction <add>, %249, %cst_73 [1] : vector<8x8xf32> to vector<8xf32>
    %251 = vector.shape_cast %250 : vector<8xf32> to vector<8x1xf32>
    %252 = vector.broadcast %251 : vector<8x1xf32> to vector<8x8xf32>
    %253 = arith.divf %249, %252 : vector<8x8xf32>
    %cst_74 = arith.constant dense<0.000000e+00> : vector<8x8xf32>
    %254 = tpu.matmul %253, %220, %cst_74 {dimension_numbers = #tpu.dot_dimension_numbers<[1], [0], [0], [1], [0, 0, 1, 1], [], []>} : vector<8x8xf32>, vector<8x8xf32>, vector<8x8xf32> -> vector<8x8xf32>
    %255 = vector.extract_strided_slice %6 {offsets = [8, 16], sizes = [8, 8], strides = [1, 1]} : vector<16x32xf32> to vector<8x8xf32>
    %256 = vector.extract_strided_slice %7 {offsets = [8, 16], sizes = [8, 8], strides = [1, 1]} : vector<16x32xf32> to vector<8x8xf32>
    %257 = vector.extract_strided_slice %8 {offsets = [8, 16], sizes = [8, 8], strides = [1, 1]} : vector<16x32xf32> to vector<8x8xf32>
    %cst_75 = arith.constant dense<0.000000e+00> : vector<8x8xf32>
    %258 = tpu.matmul %255, %256, %cst_75 {dimension_numbers = #tpu.dot_dimension_numbers<[1], [1], [0], [0], [0, 0, 1, 0], [], []>} : vector<8x8xf32>, vector<8x8xf32>, vector<8x8xf32> -> vector<8x8xf32>
    %cst_76 = arith.constant 0.353553385 : f32
    %259 = vector.broadcast %cst_76 : f32 to vector<8x8xf32>
    %260 = arith.mulf %258, %259 : vector<8x8xf32>
    %261 = arith.addf %260, %179 : vector<8x8xf32>
    %262 = vector.broadcast %180 : vector<8x1xf32> to vector<8x8xf32>
    %263 = arith.mulf %261, %262 : vector<8x8xf32>
    %cst_77 = arith.constant dense<0xFF800000> : vector<8xf32>
    %264 = vector.multi_reduction <maximumf>, %263, %cst_77 [1] : vector<8x8xf32> to vector<8xf32>
    %265 = vector.shape_cast %264 : vector<8xf32> to vector<8x1xf32>
    %266 = vector.broadcast %265 : vector<8x1xf32> to vector<8x8xf32>
    %267 = arith.subf %263, %266 : vector<8x8xf32>
    %268 = math.exp %267 : vector<8x8xf32>
    %cst_78 = arith.constant dense<0.000000e+00> : vector<8xf32>
    %269 = vector.multi_reduction <add>, %268, %cst_78 [1] : vector<8x8xf32> to vector<8xf32>
    %270 = vector.shape_cast %269 : vector<8xf32> to vector<8x1xf32>
    %271 = vector.broadcast %270 : vector<8x1xf32> to vector<8x8xf32>
    %272 = arith.divf %268, %271 : vector<8x8xf32>
    %273 = vector.extract_strided_slice %25 {offsets = [8, 16], sizes = [8, 8], strides = [1, 1]} : vector<16x32xf32> to vector<8x8xf32>
    %274 = arith.addf %273, %179 : vector<8x8xf32>
    %275 = vector.broadcast %180 : vector<8x1xf32> to vector<8x8xf32>
    %276 = arith.mulf %274, %275 : vector<8x8xf32>
    %cst_79 = arith.constant dense<0xFF800000> : vector<8xf32>
    %277 = vector.multi_reduction <maximumf>, %276, %cst_79 [1] : vector<8x8xf32> to vector<8xf32>
    %278 = vector.shape_cast %277 : vector<8xf32> to vector<8x1xf32>
    %279 = vector.broadcast %278 : vector<8x1xf32> to vector<8x8xf32>
    %280 = arith.subf %276, %279 : vector<8x8xf32>
    %281 = math.exp %280 : vector<8x8xf32>
    %cst_80 = arith.constant dense<0.000000e+00> : vector<8xf32>
    %282 = vector.multi_reduction <add>, %281, %cst_80 [1] : vector<8x8xf32> to vector<8xf32>
    %283 = vector.shape_cast %282 : vector<8xf32> to vector<8x1xf32>
    %284 = vector.broadcast %283 : vector<8x1xf32> to vector<8x8xf32>
    %285 = arith.divf %281, %284 : vector<8x8xf32>
    %286 = arith.addf %272, %285 : vector<8x8xf32>
    %cst_81 = arith.constant dense<0.000000e+00> : vector<8xf32>
    %287 = vector.multi_reduction <add>, %286, %cst_81 [1] : vector<8x8xf32> to vector<8xf32>
    %288 = vector.shape_cast %287 : vector<8xf32> to vector<8x1xf32>
    %289 = vector.broadcast %288 : vector<8x1xf32> to vector<8x8xf32>
    %290 = arith.divf %286, %289 : vector<8x8xf32>
    %cst_82 = arith.constant dense<0.000000e+00> : vector<8x8xf32>
    %291 = tpu.matmul %290, %257, %cst_82 {dimension_numbers = #tpu.dot_dimension_numbers<[1], [0], [0], [1], [0, 0, 1, 1], [], []>} : vector<8x8xf32>, vector<8x8xf32>, vector<8x8xf32> -> vector<8x8xf32>
    %292 = vector.extract_strided_slice %6 {offsets = [8, 24], sizes = [8, 8], strides = [1, 1]} : vector<16x32xf32> to vector<8x8xf32>
    %293 = vector.extract_strided_slice %7 {offsets = [8, 24], sizes = [8, 8], strides = [1, 1]} : vector<16x32xf32> to vector<8x8xf32>
    %294 = vector.extract_strided_slice %8 {offsets = [8, 24], sizes = [8, 8], strides = [1, 1]} : vector<16x32xf32> to vector<8x8xf32>
    %cst_83 = arith.constant dense<0.000000e+00> : vector<8x8xf32>
    %295 = tpu.matmul %292, %293, %cst_83 {dimension_numbers = #tpu.dot_dimension_numbers<[1], [1], [0], [0], [0, 0, 1, 0], [], []>} : vector<8x8xf32>, vector<8x8xf32>, vector<8x8xf32> -> vector<8x8xf32>
    %cst_84 = arith.constant 0.353553385 : f32
    %296 = vector.broadcast %cst_84 : f32 to vector<8x8xf32>
    %297 = arith.mulf %295, %296 : vector<8x8xf32>
    %298 = arith.addf %297, %179 : vector<8x8xf32>
    %299 = vector.broadcast %180 : vector<8x1xf32> to vector<8x8xf32>
    %300 = arith.mulf %298, %299 : vector<8x8xf32>
    %cst_85 = arith.constant dense<0xFF800000> : vector<8xf32>
    %301 = vector.multi_reduction <maximumf>, %300, %cst_85 [1] : vector<8x8xf32> to vector<8xf32>
    %302 = vector.shape_cast %301 : vector<8xf32> to vector<8x1xf32>
    %303 = vector.broadcast %302 : vector<8x1xf32> to vector<8x8xf32>
    %304 = arith.subf %300, %303 : vector<8x8xf32>
    %305 = math.exp %304 : vector<8x8xf32>
    %cst_86 = arith.constant dense<0.000000e+00> : vector<8xf32>
    %306 = vector.multi_reduction <add>, %305, %cst_86 [1] : vector<8x8xf32> to vector<8xf32>
    %307 = vector.shape_cast %306 : vector<8xf32> to vector<8x1xf32>
    %308 = vector.broadcast %307 : vector<8x1xf32> to vector<8x8xf32>
    %309 = arith.divf %305, %308 : vector<8x8xf32>
    %310 = vector.extract_strided_slice %25 {offsets = [8, 24], sizes = [8, 8], strides = [1, 1]} : vector<16x32xf32> to vector<8x8xf32>
    %311 = arith.addf %310, %179 : vector<8x8xf32>
    %312 = vector.broadcast %180 : vector<8x1xf32> to vector<8x8xf32>
    %313 = arith.mulf %311, %312 : vector<8x8xf32>
    %cst_87 = arith.constant dense<0xFF800000> : vector<8xf32>
    %314 = vector.multi_reduction <maximumf>, %313, %cst_87 [1] : vector<8x8xf32> to vector<8xf32>
    %315 = vector.shape_cast %314 : vector<8xf32> to vector<8x1xf32>
    %316 = vector.broadcast %315 : vector<8x1xf32> to vector<8x8xf32>
    %317 = arith.subf %313, %316 : vector<8x8xf32>
    %318 = math.exp %317 : vector<8x8xf32>
    %cst_88 = arith.constant dense<0.000000e+00> : vector<8xf32>
    %319 = vector.multi_reduction <add>, %318, %cst_88 [1] : vector<8x8xf32> to vector<8xf32>
    %320 = vector.shape_cast %319 : vector<8xf32> to vector<8x1xf32>
    %321 = vector.broadcast %320 : vector<8x1xf32> to vector<8x8xf32>
    %322 = arith.divf %318, %321 : vector<8x8xf32>
    %323 = arith.addf %309, %322 : vector<8x8xf32>
    %cst_89 = arith.constant dense<0.000000e+00> : vector<8xf32>
    %324 = vector.multi_reduction <add>, %323, %cst_89 [1] : vector<8x8xf32> to vector<8xf32>
    %325 = vector.shape_cast %324 : vector<8xf32> to vector<8x1xf32>
    %326 = vector.broadcast %325 : vector<8x1xf32> to vector<8x8xf32>
    %327 = arith.divf %323, %326 : vector<8x8xf32>
    %cst_90 = arith.constant dense<0.000000e+00> : vector<8x8xf32>
    %328 = tpu.matmul %327, %294, %cst_90 {dimension_numbers = #tpu.dot_dimension_numbers<[1], [0], [0], [1], [0, 0, 1, 1], [], []>} : vector<8x8xf32>, vector<8x8xf32>, vector<8x8xf32> -> vector<8x8xf32>
    %329 = tpu.concatenate %217, %254, %291, %328 in 1 : vector<8x8xf32>, vector<8x8xf32>, vector<8x8xf32>, vector<8x8xf32> -> vector<8x32xf32>
    %330 = tpu.concatenate %178, %329 in 0 : vector<8x32xf32>, vector<8x32xf32> -> vector<16x32xf32>
    %c0_91 = arith.constant 0 : index
    %c0_92 = arith.constant 0 : index
    %331 = vector.load %arg12[%c0_91, %c0_92] : memref<32x32xf32, #tpu.memory_space<vmem>>, vector<32x32xf32>
    %cst_93 = arith.constant dense<0.000000e+00> : vector<16x32xf32>
    %332 = tpu.matmul %330, %331, %cst_93 {dimension_numbers = #tpu.dot_dimension_numbers<[1], [0], [0], [1], [0, 0, 1, 1], [], []>} : vector<16x32xf32>, vector<32x32xf32>, vector<16x32xf32> -> vector<16x32xf32>
    %c0_94 = arith.constant 0 : index
    %c0_95 = arith.constant 0 : index
    %333 = vector.load %arg13[%c0_94, %c0_95] : memref<1x32xf32, #tpu.memory_space<vmem>>, vector<1x32xf32>
    %334 = vector.broadcast %333 : vector<1x32xf32> to vector<16x32xf32>
    %335 = arith.addf %332, %334 : vector<16x32xf32>
    %336 = arith.addf %0, %335 : vector<16x32xf32>
    %cst_96 = arith.constant dense<0.000000e+00> : vector<16xf32>
    %337 = vector.multi_reduction <add>, %336, %cst_96 [1] : vector<16x32xf32> to vector<16xf32>
    %338 = vector.shape_cast %337 : vector<16xf32> to vector<16x1xf32>
    %cst_97 = arith.constant 3.200000e+01 : f32
    %339 = vector.broadcast %cst_97 : f32 to vector<16x1xf32>
    %340 = arith.divf %338, %339 : vector<16x1xf32>
    %341 = vector.broadcast %340 : vector<16x1xf32> to vector<16x32xf32>
    %342 = arith.subf %336, %341 : vector<16x32xf32>
    %343 = arith.mulf %342, %342 : vector<16x32xf32>
    %cst_98 = arith.constant dense<0.000000e+00> : vector<16xf32>
    %344 = vector.multi_reduction <add>, %343, %cst_98 [1] : vector<16x32xf32> to vector<16xf32>
    %345 = vector.shape_cast %344 : vector<16xf32> to vector<16x1xf32>
    %cst_99 = arith.constant 3.200000e+01 : f32
    %346 = vector.broadcast %cst_99 : f32 to vector<16x1xf32>
    %347 = arith.divf %345, %346 : vector<16x1xf32>
    %348 = vector.broadcast %340 : vector<16x1xf32> to vector<16x32xf32>
    %349 = arith.subf %336, %348 : vector<16x32xf32>
    %cst_100 = arith.constant 9.99999974E-6 : f32
    %350 = vector.broadcast %cst_100 : f32 to vector<16x1xf32>
    %351 = arith.addf %347, %350 : vector<16x1xf32>
    %352 = math.rsqrt %351 : vector<16x1xf32>
    %353 = vector.broadcast %352 : vector<16x1xf32> to vector<16x32xf32>
    %354 = arith.mulf %349, %353 : vector<16x32xf32>
    %c0_101 = arith.constant 0 : index
    %c0_102 = arith.constant 0 : index
    %355 = vector.load %arg14[%c0_101, %c0_102] : memref<1x32xf32, #tpu.memory_space<vmem>>, vector<1x32xf32>
    %356 = vector.broadcast %355 : vector<1x32xf32> to vector<16x32xf32>
    %357 = arith.mulf %354, %356 : vector<16x32xf32>
    %c0_103 = arith.constant 0 : index
    %c0_104 = arith.constant 0 : index
    %358 = vector.load %arg15[%c0_103, %c0_104] : memref<1x32xf32, #tpu.memory_space<vmem>>, vector<1x32xf32>
    %359 = vector.broadcast %358 : vector<1x32xf32> to vector<16x32xf32>
    %360 = arith.addf %357, %359 : vector<16x32xf32>
    %c0_105 = arith.constant 0 : index
    %c0_106 = arith.constant 0 : index
    %361 = vector.load %arg16[%c0_105, %c0_106] : memref<16x32xf32, #tpu.memory_space<vmem>>, vector<16x32xf32>
    tpu.vector_store %arg16[%c0_105, %c0_106], %360 {strides = array<i32>} : memref<16x32xf32, #tpu.memory_space<vmem>>, vector<16x32xf32>,
    return
  }
}

</mosaic_0001>

<bundles_post_ra>
// kernel: attention_block_pallas.1
= control target key start
LH: loop header
LB: loop body
LE: loop exit
PB: predicated region body
PF: predicated region fallthrough
CT: control target
= control target key end

     0   :  { %s3843_s0 = inlined_call_operand.vmem [shape: f32[16,32], index: 0, kind: input, shape index: {}]   ;;  %s3844_s1 = inlined_call_operand.vmem [shape: f32[128,64], index: 1, kind: input, shape index: {}]   ;;  %s3845_s2 = inlined_call_operand.vmem [shape: f32[16,8], index: 2, kind: input, shape index: {}]   ;;  %s3846_s3 = inlined_call_operand.vmem [shape: f32[16,1], index: 3, kind: input, shape index: {}]   ;;  %s3847_s4 = inlined_call_operand.vmem [shape: f32[32,96], index: 4, kind: input, shape index: {}]   ;;  %s3848_s5 = inlined_call_operand.vmem [shape: f32[1,96], index: 5, kind: input, shape index: {}]   ;;  %s3849_s6 = inlined_call_operand.vmem [shape: f32[64,32], index: 6, kind: input, shape index: {}]   ;;  %s3850_s7 = inlined_call_operand.vmem [shape: f32[1,32], index: 7, kind: input, shape index: {}]   ;;  %s3851_s8 = inlined_call_operand.vmem [shape: f32[32,32], index: 8, kind: input, shape index: {}]   ;;  %s3852_s9 = inlined_call_operand.vmem [shape: f32[1,32], index: 9, kind: input, shape index: {}]   ;;  %s3853_s10 = inlined_call_operand.vmem [shape: f32[16,128], index: 10, kind: input, shape index: {}]   ;;  %s3854_s11 = inlined_call_operand.vmem [shape: f32[128,32], index: 11, kind: input, shape index: {}]   ;;  %s3855_s12 = inlined_call_operand.vmem [shape: f32[32,32], index: 12, kind: input, shape index: {}]   ;;  %s3856_s13 = inlined_call_operand.vmem [shape: f32[1,32], index: 13, kind: input, shape index: {}]   ;;  %s3857_s14 = inlined_call_operand.vmem [shape: f32[1,32], index: 14, kind: input, shape index: {}]   ;;  %s3858_s15 = inlined_call_operand.vmem [shape: f32[1,32], index: 15, kind: input, shape index: {}]   ;;  %s3859_s16 = inlined_call_operand.hbm [shape: f32[16,32], index: 16, kind: output, shape index: {}]  }
   0x1   :  { %3861 = sst [smem:[#allocation5_spill]] %s3843_s0 }
   0x2   :  { %v165_v0 = vld [vmem:[%s3849_s6] sm:$0xff]  ;;  %v166_v1 = vld [vmem:[%s3849_s6 + $0x8] sm:$0xff]  ;;  %v167_v2 = vld [vmem:[%s3849_s6 + $0x10] sm:$0xff]  ;;  %vm180_vm0 = vcmask 523264   ;;  %vm67_vm1 = vcmask 261120   ;;  %s3862_s18 = sld [smem:[#allocation5_spill]] }
   0x3   :  { %v2861_v3 = vpack.c.bf16 %v166_v1, %v165_v0  ;;  %v168_v4 = vld [vmem:[%s3849_s6 + $0x18] sm:$0xff]  ;;  %v169_v6 = vld [vmem:[%s3849_s6 + $0x20] sm:$0xff]  ;;  %v170_v7 = vld [vmem:[%s3849_s6 + $0x28] sm:$0xff] }
   0x4   :  { %v2865_v5 = vpack.c.bf16 %v168_v4, %v167_v2  ;;  %v149_v8 = vld [vmem:[%s3844_s1] sm:$0xff]  ;;  %v2869_v9 = vpack.c.bf16 %v170_v7, %v169_v6  ;;  %v171_v10 = vld [vmem:[%s3849_s6 + $0x30] sm:$0xff]  ;;  %v172_v11 = vld [vmem:[%s3849_s6 + $0x38] sm:$0xff] }
   0x5   :  { %2862 = vmatprep.subr.bf16.mxu1 %v2861_v3  ;;  %2671 = vmatprep.mubr.msk.f32.mxu1 %vm180_vm0, %v149_v8  ;;  %v56_v12 = vld [vmem:[%s3847_s4] sm:$0xff]  ;;  %v57_v13 = vld [vmem:[%s3847_s4 + $0x8] sm:$0xff]  ;;  %v58_v14 = vld [vmem:[%s3847_s4 + $0x10] sm:$0xff]  ;;  %v2873_v15 = vpack.c.bf16 %v172_v11, %v171_v10 }
   0x6   :  { %2864 = vmatpush3.bf16.msra.mxu1 %v2861_v3  ;;  %v2853_v16 = vpack.c.bf16 %v57_v13, %v56_v12  ;;  %v59_v17 = vld [vmem:[%s3847_s4 + $0x18] sm:$0xff]  ;;  %v390_v20 = vld [vmem:[%s3851_s8] sm:$0xff]  ;;  %v391_v21 = vld [vmem:[%s3851_s8 + $0x8] sm:$0xff] }
   0x7   :  { %2866 = vmatprep.subr.bf16.mxu1 %v2865_v5  ;;  %v2857_v19 = vpack.c.bf16 %v59_v17, %v58_v14 }
   0x8   :  { %v54_v18 = vld [vmem:[%s3862_s18] sm:$0xff] }
   0x9   :  { %2652 = vmatprep.mubr.msk.f32.mxu0 %vm67_vm1, %v54_v18 }
   0xa   :  { %2868 = vmatpush3.bf16.msra.mxu1 %v2865_v5 }
   0xb   :  { %2870 = vmatprep.subr.bf16.mxu1 %v2869_v9 }
   0xc   :  { %21 = vsyncpa [#allocation3], 0  ;;  %2854 = vmatprep.subr.bf16.mxu0 %v2853_v16  ;;  %v2877_v22 = vpack.c.bf16 %v391_v21, %v390_v20  ;;  %v150_v23 = vld [vmem:[%s3844_s1 + $0x8] sm:$0xff]  ;;  %v151_v25 = vld [vmem:[%s3844_s1 + $0x10] sm:$0xff]  ;;  %v3056_v42 = vmov 0.0   ;;  %vm3057_vm2 = vmmov 0  }
   0xd   :  { %2856 = vmatpush3.bf16.msra.mxu0 %v2853_v16  ;;  %v55_v24 = vld [vmem:[%s3862_s18 + $0x8] sm:$0xff]  ;;  %v152_v26 = vld [vmem:[%s3844_s1 + $0x18] sm:$0xff]  ;;  %v153_v27 = vld [vmem:[%s3844_s1 + $0x20] sm:$0xff]  ;;  %s3061_s29 = smov 80   ;;  %s3062_s30 = smov 112   ;;  %vm710_vm3 = vcmask 64512  }
   0xe   :  { %2872 = vmatpush3.bf16.msra.mxu1 %v2869_v9  ;;  %2858 = vmatprep.subr.bf16.mxu0 %v2857_v19  ;;  %v154_v28 = vld [vmem:[%s3844_s1 + $0x28] sm:$0xff]  ;;  %v155_v29 = vld [vmem:[%s3844_s1 + $0x30] sm:$0xff]  ;;  %v156_v30 = vld [vmem:[%s3844_s1 + $0x38] sm:$0xff]  ;;  %s3063_s0 = smov 72   ;;  %s3064_s6 = smov 104   ;;  %vm1196_vm4 = vcmask 195712  }
   0xf   :  { %2874 = vmatprep.subr.bf16.mxu1 %v2873_v15  ;;  %v157_v31 = vld [vmem:[%s3844_s1 + $0x40] sm:$0xff]  ;;  %v158_v32 = vld [vmem:[%s3844_s1 + $0x48] sm:$0xff]  ;;  %v159_v33 = vld [vmem:[%s3844_s1 + $0x50] sm:$0xff]  ;;  %s3065_s23 = smov 8   ;;  %s3067_s24 = smov 16   ;;  %vm997_vm5 = vcmask 130112  }
  0x10   :  { %v160_v34 = vld [vmem:[%s3844_s1 + $0x58] sm:$0xff]  ;;  %v161_v35 = vld [vmem:[%s3844_s1 + $0x60] sm:$0xff]  ;;  %v162_v36 = vld [vmem:[%s3844_s1 + $0x68] sm:$0xff]  ;;  %s3068_s26 = smov 24   ;;  %vm1395_vm6 = vcmask 261312   ;;  %vm1510_vm7 = vcmask 130048  }
  0x11   :  { %2860 = vmatpush3.bf16.msra.mxu0 %v2857_v19  ;;  %v163_v37 = vld [vmem:[%s3844_s1 + $0x70] sm:$0xff]  ;;  %v164_v38 = vld [vmem:[%s3844_s1 + $0x78] sm:$0xff]  ;;  %v3286_v43 = vld [vmem:[%s3850_s7] ss:$0 sm:$0xff]  ;;  %s3059_s7 = smov 120   ;;  %vm1512_vm8 = vcmask 195584  }
  0x12   :  { %2876 = vmatpush3.bf16.msra.mxu1 %v2873_v15  ;;  %2878 = vmatprep.subr.bf16.mxu0 %v2877_v22  ;;  %v392_v39 = vld [vmem:[%s3851_s8 + $0x10] sm:$0xff]  ;;  %v393_v40 = vld [vmem:[%s3851_s8 + $0x18] sm:$0xff]  ;;  %v2472_v44 = vld [vmem:[%s3848_s5] ss:$0 sm:$0xff]  ;;  %s3058_s8 = smov 96   ;;  %s3060_s5 = smov 88  }
  0x13   :  { %v2881_v41 = vpack.c.bf16 %v393_v40, %v392_v39  ;;  %2762 = vmatprep.subr.mxu1 %v3056_v42  ;;  %v626_v39 = vld [vmem:[%s3853_s10] sm:$0xff]  ;;  %s3073_s1 = smov [#allocation2]  }
  0x14   :  { %2653 = vmatmul.mubr.msk.f32.vlgmr.msra.gmra.mrb[0].mxu0 %vm67_vm1, %v55_v24  ;;  %s2461_s27 = sshll.u32 %s3073_s1, 4  ;;  %s2462_s27 = int_to_ptr.vmem [resolvable:$true] %s2461_s27 }
  0x15   :  { %2672 = vmatmul.mubr.msk.f32.vlgmr.msra.gmra.mrb[0].mxu1 %vm180_vm0, %v150_v23  ;;  %2880 = vmatpush3.bf16.msra.mxu0 %v2877_v22  ;;  %s3032_s28 = scalar_lea.vmem %s2462_s27, 256  ;;  %p3037_p1 = scmp.lt.s32.totalorder %s2462_s27, %s2462_s27 }
  0x16   :  { %2674 = vmatprep.mubr.msk.f32.mxu1 %vm180_vm0, %v151_v25  ;;  %2882 = vmatprep.subr.bf16.mxu0 %v2881_v41  ;;  %p3033_p0 = scmp.ne.s32.totalorder %s2462_s27, %s3032_s28  ;;  %p3038_p2 = scmp.lt.s32.totalorder %s3032_s28, %s3032_s28 }
  0x18   :  { %p3039_p3 = por %p3038_p2, %p3037_p1 }
  0x19   :  { %2675 = vmatmul.mubr.msk.f32.gmra.mrb[2].mxu1 %vm180_vm0, %v152_v26  ;;  %2884 = vmatpush3.bf16.msra.mxu0 %v2881_v41  ;;  %v3375_v41 = vld [vmem:[%s3845_s2] sm:$0xff] }
  0x1a   :  { %2677 = vmatprep.mubr.msk.f32.mxu1 %vm180_vm0, %v153_v27  ;;  %p3040_p4 = pnand %p3039_p3, %p3033_p0 }
  0x1d   :  { %2678 = vmatmul.mubr.msk.f32.gmra.mrb[4].mxu1 %vm180_vm0, %v154_v28 }
  0x1e   :  { %2680 = vmatprep.mubr.msk.f32.mxu1 %vm180_vm0, %v155_v29 }
  0x21   :  { %2681 = vmatmul.mubr.msk.f32.gmra.mrb[6].mxu1 %vm180_vm0, %v156_v30 }
  0x22   :  { %2683 = vmatprep.mubr.msk.f32.mxu1 %vm180_vm0, %v157_v31 }
  0x25   :  { %2684 = vmatmul.mubr.msk.f32.gmra.mrb[8].mxu1 %vm180_vm0, %v158_v32 }
  0x26   :  { %2686 = vmatprep.mubr.msk.f32.mxu1 %vm180_vm0, %v159_v33 }
  0x29   :  { %2687 = vmatmul.mubr.msk.f32.gmra.mrb[10].mxu1 %vm180_vm0, %v160_v34 }
  0x2a   :  { %2689 = vmatprep.mubr.msk.f32.mxu1 %vm180_vm0, %v161_v35 }
  0x2d   :  { %2690 = vmatmul.mubr.msk.f32.gmra.mrb[12].mxu1 %vm180_vm0, %v162_v36 }
  0x2e   :  { %2692 = vmatprep.mubr.msk.f32.mxu1 %vm180_vm0, %v163_v37 }
  0x31   :  { %2693 = vmatmul.mubr.msk.f32.gmra.mrb[14].mxu1 %vm180_vm0, %v164_v38 }
  0x32   :  { %2764 = vmatprep.mubr.msk.f32.mxu1 %vm3057_vm2, %v3056_v42 }
  0xe7   :  { %v2654_v46 = vpop.f32.mrb[0].mxu0 }
  0xe8   :  { %v2673_v45 = vpop.f32.mrb[0].mxu1  ;;  %v140_v49 = vpop.f32.mrb[1].mxu0  ;;  %v3311_v2 = vadd.f32 %v2654_v46, %v2472_v44 }
  0xe9   :  { %v301_v47 = vadd.f32 %v2673_v45, %v3286_v43  ;;  %v295_v48 = vpop.f32.mrb[1].mxu1  ;;  %v3293_v51 = vadd.f32 %v2472_v44, %v140_v49  ;;  %v705_v44 = vld [vmem:[%s3846_s3] sm:$0xff]  ;;  %v3066_v45 = vmov 0  }
  0xea   :  { %v296_v50 = vadd.f32 %v3286_v43, %v295_v48  ;;  %2945 = vset.pattern.permute.xlu1 %v3066_v45  ;;  %2944 = vset.pattern.permute.xlu0 %v3066_v45  ;;  %v706_v48 = vld [vmem:[%s3846_s3 + $0x8] sm:$0xff] }
  0xeb   :  { %708 = vrot.lane.b32.xlu0 %v3293_v51, %s3058_s8  ;;  %899 = vrot.lane.b32.xlu1 %v3293_v51, %s3059_s7  ;;  %v375_v54 = vmax.f32 %v301_v47, 0.0 }
  0xec   :  { %v374_v52 = vmax.f32 %v296_v50, 0.0  ;;  %v2676_v53 = vpop.f32.mrb[2].mxu1  ;;  %v3406_v50 = vld [vmem:[%s3845_s2 + $0x8] sm:$0xff] }
  0xed   :  { %v311_v55 = vadd.f32 %v2676_v53, %v3286_v43  ;;  %v305_v56 = vpop.f32.mrb[3].mxu1 }
  0xee   :  { %v306_v57 = vadd.f32 %v3286_v43, %v305_v56  ;;  %2703 = vmatprep.mubr.msk.f32.mxu0 %vm67_vm1, %v374_v52 }
  0xef   :  { %2704 = vmatmul.mubr.msk.f32.vlgmr.msra.gmra.mrb[2].mxu0 %vm67_vm1, %v375_v54  ;;  %901 = vrot.lane.b32.xlu0 %v3293_v51, %s3060_s5  ;;  %v377_v60 = vmax.f32 %v311_v55, 0.0  ;;  %v3428_v55 = vld [vmem:[%s3852_s9] ss:$0 sm:$0xff] }
  0xf0   :  { %v376_v58 = vmax.f32 %v306_v57, 0.0  ;;  %v2679_v59 = vpop.f32.mrb[4].mxu1  ;;  %1101 = vrot.lane.b32.xlu1 %v3293_v51, %s3061_s29  ;;  %v595_v57 = vld [vmem:[%s3854_s11 + $0x8] sm:$0xff] }
  0xf1   :  { %v321_v61 = vadd.f32 %v2679_v59, %v3286_v43  ;;  %v315_v62 = vpop.f32.mrb[5].mxu1 }
  0xf2   :  { %v316_v63 = vadd.f32 %v3286_v43, %v315_v62  ;;  %2706 = vmatprep.mubr.msk.f32.mxu0 %vm67_vm1, %v376_v58 }
  0xf3   :  { %2707 = vmatmul.mubr.msk.f32.gmra.mrb[4].mxu0 %vm67_vm1, %v377_v60  ;;  %1099 = vrot.lane.b32.xlu0 %v3293_v51, %s3062_s30  ;;  %v379_v3 = vmax.f32 %v321_v61, 0.0  ;;  %v594_v60 = vld [vmem:[%s3854_s11] sm:$0xff] }
  0xf4   :  { %v378_v0 = vmax.f32 %v316_v63, 0.0  ;;  %v2682_v1 = vpop.f32.mrb[6].mxu1  ;;  %1300 = vrot.lane.b32.xlu1 %v3293_v51, %s3063_s0 }
  0xf5   :  { %v331_v4 = vadd.f32 %v2682_v1, %v3286_v43  ;;  %v325_v5 = vpop.f32.mrb[7].mxu1  ;;  %v597_v1 = vld [vmem:[%s3854_s11 + $0x18] sm:$0xff] }
  0xf6   :  { %v326_v6 = vadd.f32 %v3286_v43, %v325_v5  ;;  %2709 = vmatprep.mubr.msk.f32.mxu0 %vm67_vm1, %v378_v0  ;;  %v596_v5 = vld [vmem:[%s3854_s11 + $0x10] sm:$0xff] }
  0xf7   :  { %2710 = vmatmul.mubr.msk.f32.gmra.mrb[6].mxu0 %vm67_vm1, %v379_v3  ;;  %1298 = vrot.lane.b32.xlu0 %v3293_v51, %s3064_s6  ;;  %v381_v9 = vmax.f32 %v331_v4, 0.0 }
  0xf8   :  { %v380_v7 = vmax.f32 %v326_v6, 0.0  ;;  %v2685_v8 = vpop.f32.mrb[8].mxu1  ;;  %1515 = vrot.lane.b32.xlu1 %v3311_v2, %s3058_s8 }
  0xf9   :  { %v341_v10 = vadd.f32 %v2685_v8, %v3286_v43  ;;  %v335_v11 = vpop.f32.mrb[9].mxu1 }
  0xfa   :  { %v336_v12 = vadd.f32 %v3286_v43, %v335_v11  ;;  %2712 = vmatprep.mubr.msk.f32.mxu0 %vm67_vm1, %v380_v7  ;;  %v599_v11 = vld [vmem:[%s3854_s11 + $0x28] sm:$0xff] }
  0xfb   :  { %2713 = vmatmul.mubr.msk.f32.gmra.mrb[8].mxu0 %vm67_vm1, %v381_v9  ;;  %1707 = vrot.lane.b32.xlu0 %v3311_v2, %s3060_s5  ;;  %v383_v15 = vmax.f32 %v341_v10, 0.0 }
  0xfc   :  { %v382_v13 = vmax.f32 %v336_v12, 0.0  ;;  %v2688_v14 = vpop.f32.mrb[10].mxu1  ;;  %1705 = vrot.lane.b32.xlu1 %v3311_v2, %s3059_s7 }
  0xfd   :  { %v351_v16 = vadd.f32 %v2688_v14, %v3286_v43  ;;  %v345_v17 = vpop.f32.mrb[11].mxu1  ;;  %v598_v14 = vld [vmem:[%s3854_s11 + $0x20] sm:$0xff] }
  0xfe   :  { %v346_v18 = vadd.f32 %v3286_v43, %v345_v17  ;;  %2715 = vmatprep.mubr.msk.f32.mxu0 %vm67_vm1, %v382_v13 }
  0xff   :  { %2716 = vmatmul.mubr.msk.f32.gmra.mrb[10].mxu0 %vm67_vm1, %v383_v15  ;;  %1906 = vrot.lane.b32.xlu0 %v3311_v2, %s3061_s29  ;;  %v385_v21 = vmax.f32 %v351_v16, 0.0 }
 0x100   :  { %v384_v19 = vmax.f32 %v346_v18, 0.0  ;;  %v2691_v20 = vpop.f32.mrb[12].mxu1  ;;  %1904 = vrot.lane.b32.xlu1 %v3311_v2, %s3062_s30 }
 0x101   :  { %v361_v22 = vadd.f32 %v2691_v20, %v3286_v43  ;;  %v355_v23 = vpop.f32.mrb[13].mxu1  ;;  %v601_v20 = vld [vmem:[%s3854_s11 + $0x38] sm:$0xff] }
 0x102   :  { %v356_v24 = vadd.f32 %v3286_v43, %v355_v23  ;;  %2718 = vmatprep.mubr.msk.f32.mxu0 %vm67_vm1, %v384_v19  ;;  %v600_v23 = vld [vmem:[%s3854_s11 + $0x30] sm:$0xff] }
 0x103   :  { %2719 = vmatmul.mubr.msk.f32.gmra.mrb[12].mxu0 %vm67_vm1, %v385_v21  ;;  %2104 = vrot.lane.b32.xlu0 %v3311_v2, %s3063_s0  ;;  %v387_v27 = vmax.f32 %v361_v22, 0.0 }
 0x104   :  { %v386_v25 = vmax.f32 %v356_v24, 0.0  ;;  %v2694_v26 = vpop.f32.mrb[14].mxu1  ;;  %2102 = vrot.lane.b32.xlu1 %v3311_v2, %s3064_s6 }
 0x105   :  { %v371_v28 = vadd.f32 %v2694_v26, %v3286_v43  ;;  %v365_v29 = vpop.f32.mrb[15].mxu1 }
 0x106   :  { %v366_v30 = vadd.f32 %v3286_v43, %v365_v29  ;;  %2721 = vmatprep.mubr.msk.f32.mxu0 %vm67_vm1, %v386_v25  ;;  %v603_v29 = vld [vmem:[%s3854_s11 + $0x48] sm:$0xff] }
 0x107   :  { %2722 = vmatmul.mubr.msk.f32.gmra.mrb[14].mxu0 %vm67_vm1, %v387_v27  ;;  %v389_v32 = vmax.f32 %v371_v28, 0.0  ;;  %789 = vperm.xlu0 %2944, %v705_v44  }
 0x108   :  { %v388_v31 = vmax.f32 %v366_v30, 0.0  ;;  %992 = vrot.lane.b32.xlu1 %v3375_v41, %s3065_s23 }
 0x10a   :  { %2724 = vmatprep.mubr.msk.f32.mxu0 %vm67_vm1, %v388_v31 }
 0x10b   :  { %2725 = vmatmul.mubr.msk.f32.gmra.mrb[16].mxu0 %vm67_vm1, %v389_v32  ;;  %1390 = vrot.lane.b32.xlu0 %v3375_v41, %s3068_s26  ;;  %v602_v32 = vld [vmem:[%s3854_s11 + $0x40] sm:$0xff] }
 0x10c   :  { %2759 = vmatprep.mubr.f32.mxu0 %v626_v39  ;;  %1191 = vrot.lane.b32.xlu1 %v3375_v41, %s3067_s24 }
 0x10f   :  { %1798 = vrot.lane.b32.xlu0 %v3406_v50, %s3065_s23 }
 0x110   :  { %1595 = vperm.xlu1 %2945, %v706_v48  }
 0x113   :  { %2194 = vrot.lane.b32.xlu0 %v3406_v50, %s3068_s26 }
 0x114   :  { %1996 = vrot.lane.b32.xlu1 %v3406_v50, %s3067_s24 }
 0x15d   :  { %v709_v33 = vpop.permute.xlu0 %708  ;;  %v900_v34 = vpop.permute.xlu1 %899 }
 0x15e   :  { %2763 = vmatpush3.xpose.msk.msra.mxu1 %vm710_vm3, %v709_v33 }
 0x15f   :  { %2772 = vmatprep.subr.mxu1 %v3056_v42 }
 0x161   :  { %2765 = vmatmul.mubr.msk.f32.vlgmr.msra.gmra.mrb[16].mxu1 %vm710_vm3, %v3293_v51  ;;  %v902_v35 = vpop.permute.xlu0 %901 }
 0x162   :  { %v1102_v36 = vpop.permute.xlu1 %1101  ;;  %2773 = vmatpush3.xpose.msk.msra.mxu1 %vm710_vm3, %v902_v35  ;;  %2774 = vmatprep.mubr.msk.f32.mxu1 %vm3057_vm2, %v3056_v42 }
 0x163   :  { %2782 = vmatprep.subr.mxu1 %v3056_v42 }
 0x165   :  { %2775 = vmatmul.mubr.msk.f32.vlgmr.msra.gmra.mrb[18].mxu1 %vm710_vm3, %v900_v34  ;;  %v1100_v37 = vpop.permute.xlu0 %1099 }
 0x166   :  { %v1301_v38 = vpop.permute.xlu1 %1300  ;;  %2783 = vmatpush3.xpose.msk.msra.mxu1 %vm710_vm3, %v1102_v36  ;;  %2784 = vmatprep.mubr.msk.f32.mxu1 %vm3057_vm2, %v3056_v42 }
 0x167   :  { %2792 = vmatprep.subr.mxu1 %v3056_v42 }
 0x169   :  { %2785 = vmatmul.mubr.msk.f32.vlgmr.msra.gmra.mrb[20].mxu1 %vm710_vm3, %v1100_v37  ;;  %v1299_v40 = vpop.permute.xlu0 %1298 }
 0x16a   :  { %2793 = vmatpush3.xpose.msk.msra.mxu1 %vm710_vm3, %v1301_v38  ;;  %2794 = vmatprep.mubr.msk.f32.mxu1 %vm3057_vm2, %v3056_v42  ;;  %v1516_v43 = vpop.permute.xlu1 %1515  ;;  %v605_v38 = vld [vmem:[%s3854_s11 + $0x58] sm:$0xff] }
 0x16b   :  { %2802 = vmatprep.subr.mxu1 %v3056_v42 }
 0x16d   :  { %2795 = vmatmul.mubr.msk.f32.vlgmr.msra.gmra.mrb[22].mxu1 %vm710_vm3, %v1299_v40  ;;  %v1708_v46 = vpop.permute.xlu0 %1707 }
 0x16e   :  { %2803 = vmatpush3.xpose.msk.msra.mxu1 %vm710_vm3, %v1516_v43  ;;  %2804 = vmatprep.mubr.msk.f32.mxu1 %vm3057_vm2, %v3056_v42  ;;  %v1706_v47 = vpop.permute.xlu1 %1705  ;;  %v604_v43 = vld [vmem:[%s3854_s11 + $0x50] sm:$0xff] }
 0x16f   :  { %2812 = vmatprep.subr.mxu1 %v3056_v42 }
 0x171   :  { %2805 = vmatmul.mubr.msk.f32.vlgmr.msra.gmra.mrb[24].mxu1 %vm710_vm3, %v3311_v2  ;;  %v1907_v49 = vpop.permute.xlu0 %1906 }
 0x172   :  { %2813 = vmatpush3.xpose.msk.msra.mxu1 %vm710_vm3, %v1708_v46  ;;  %2814 = vmatprep.mubr.msk.f32.mxu1 %vm3057_vm2, %v3056_v42  ;;  %v1905_v52 = vpop.permute.xlu1 %1904 }
 0x173   :  { %2822 = vmatprep.subr.mxu1 %v3056_v42 }
 0x175   :  { %2815 = vmatmul.mubr.msk.f32.vlgmr.msra.gmra.mrb[26].mxu1 %vm710_vm3, %v1706_v47  ;;  %v2105_v53 = vpop.permute.xlu0 %2104 }
 0x176   :  { %2823 = vmatpush3.xpose.msk.msra.mxu1 %vm710_vm3, %v1907_v49  ;;  %2824 = vmatprep.mubr.msk.f32.mxu1 %vm3057_vm2, %v3056_v42  ;;  %v2103_v54 = vpop.permute.xlu1 %2102  ;;  %v607_v49 = vld [vmem:[%s3854_s11 + $0x68] sm:$0xff] }
 0x177   :  { %2832 = vmatprep.subr.mxu1 %v3056_v42 }
 0x179   :  { %2825 = vmatmul.mubr.msk.f32.vlgmr.msra.gmra.mrb[28].mxu1 %vm710_vm3, %v1905_v52 }
 0x17a   :  { %2833 = vmatpush3.xpose.msk.msra.mxu1 %vm710_vm3, %v2105_v53  ;;  %2834 = vmatprep.mubr.msk.f32.mxu1 %vm3057_vm2, %v3056_v42 }
 0x17d   :  { %2835 = vmatmul.mubr.msk.f32.vlgmr.msra.gmra.mrb[30].mxu1 %vm710_vm3, %v2103_v54  ;;  %v606_v54 = vld [vmem:[%s3854_s11 + $0x60] sm:$0xff] }
 0x1c2   :  { %v2705_v56 = vpop.f32.mrb[2].mxu0 }
 0x1c3   :  { %v521_v58 = vadd.f32 %v2705_v56, %v3428_v55  ;;  %v515_v59 = vpop.f32.mrb[3].mxu0 }
 0x1c4   :  { %v516_v61 = vadd.f32 %v3428_v55, %v515_v59 }
 0x1c5   :  { %v611_v62 = vmul.f32 %v595_v57, %v521_v58 }
 0x1c6   :  { %v610_v63 = vmul.f32 %v594_v60, %v516_v61  ;;  %v2708_v0 = vpop.f32.mrb[4].mxu0  ;;  %v609_v61 = vld [vmem:[%s3854_s11 + $0x78] sm:$0xff] }
 0x1c7   :  { %v531_v3 = vadd.f32 %v2708_v0, %v3428_v55  ;;  %v525_v4 = vpop.f32.mrb[5].mxu0  ;;  %v608_v0 = vld [vmem:[%s3854_s11 + $0x70] sm:$0xff]  ;;  %s3070_s11 = smov 48  }
 0x1c8   :  { %v526_v6 = vadd.f32 %v3428_v55, %v525_v4  ;;  %v2885_v7 = vpack.c.bf16 %v611_v62, %v610_v63 }
 0x1c9   :  { %v613_v8 = vmul.f32 %v597_v1, %v531_v3 }
 0x1ca   :  { %v612_v9 = vmul.f32 %v596_v5, %v526_v6  ;;  %v2711_v10 = vpop.f32.mrb[6].mxu0  ;;  %2886 = vmatprep.subr.bf16.mxu0 %v2885_v7 }
 0x1cb   :  { %v541_v12 = vadd.f32 %v2711_v10, %v3428_v55  ;;  %v535_v13 = vpop.f32.mrb[7].mxu0  ;;  %2888 = vmatpush3.bf16.msra.mxu0 %v2885_v7  ;;  %v627_v7 = vld [vmem:[%s3853_s10 + $0x8] sm:$0xff]  ;;  %s3069_s10 = smov 64  }
 0x1cc   :  { %v536_v15 = vadd.f32 %v3428_v55, %v535_v13  ;;  %v2889_v16 = vpack.c.bf16 %v613_v8, %v612_v9 }
 0x1cd   :  { %v615_v17 = vmul.f32 %v599_v11, %v541_v12 }
 0x1ce   :  { %v614_v18 = vmul.f32 %v598_v14, %v536_v15  ;;  %v2714_v19 = vpop.f32.mrb[8].mxu0  ;;  %2890 = vmatprep.subr.bf16.mxu0 %v2889_v16 }
 0x1cf   :  { %v551_v21 = vadd.f32 %v2714_v19, %v3428_v55  ;;  %v545_v22 = vpop.f32.mrb[9].mxu0  ;;  %2892 = vmatpush3.bf16.msra.mxu0 %v2889_v16 }
 0x1d0   :  { %v546_v24 = vadd.f32 %v3428_v55, %v545_v22  ;;  %v2893_v25 = vpack.c.bf16 %v615_v17, %v614_v18 }
 0x1d1   :  { %v617_v26 = vmul.f32 %v601_v20, %v551_v21 }
 0x1d2   :  { %v616_v27 = vmul.f32 %v600_v23, %v546_v24  ;;  %v2717_v28 = vpop.f32.mrb[10].mxu0  ;;  %2894 = vmatprep.subr.bf16.mxu0 %v2893_v25  ;;  %v993_v23 = vpop.permute.xlu1 %992 }
 0x1d3   :  { %v561_v30 = vadd.f32 %v2717_v28, %v3428_v55  ;;  %v555_v31 = vpop.f32.mrb[11].mxu0  ;;  %2896 = vmatpush3.bf16.msra.mxu0 %v2893_v25  ;;  %v3516_v24 = vpop.permute.xlu0 %789 }
 0x1d4   :  { %v556_v33 = vadd.f32 %v3428_v55, %v555_v31  ;;  %v2897_v34 = vpack.c.bf16 %v617_v26, %v616_v27 }
 0x1d5   :  { %v619_v35 = vmul.f32 %v603_v29, %v561_v30 }
 0x1d6   :  { %v618_v36 = vmul.f32 %v602_v32, %v556_v33  ;;  %v2720_v37 = vpop.f32.mrb[12].mxu0  ;;  %2898 = vmatprep.subr.bf16.mxu0 %v2897_v34  ;;  %v1192_v26 = vpop.permute.xlu1 %1191 }
 0x1d7   :  { %v571_v39 = vadd.f32 %v2720_v37, %v3428_v55  ;;  %v565_v40 = vpop.f32.mrb[13].mxu0  ;;  %2900 = vmatpush3.bf16.msra.mxu0 %v2897_v34  ;;  %v1391_v25 = vpop.permute.xlu0 %1390 }
 0x1d8   :  { %v566_v44 = vadd.f32 %v3428_v55, %v565_v40  ;;  %v2901_v45 = vpack.c.bf16 %v619_v35, %v618_v36 }
 0x1d9   :  { %v621_v46 = vmul.f32 %v605_v38, %v571_v39 }
 0x1da   :  { %v620_v47 = vmul.f32 %v604_v43, %v566_v44  ;;  %v2723_v48 = vpop.f32.mrb[14].mxu0  ;;  %2902 = vmatprep.subr.bf16.mxu0 %v2901_v45  ;;  %v3518_v28 = vpop.permute.xlu1 %1595 }
 0x1db   :  { %v581_v52 = vadd.f32 %v2723_v48, %v3428_v55  ;;  %v575_v53 = vpop.f32.mrb[15].mxu0  ;;  %2904 = vmatpush3.bf16.msra.mxu0 %v2901_v45  ;;  %v1799_v27 = vpop.permute.xlu0 %1798 }
 0x1dc   :  { %v576_v56 = vadd.f32 %v3428_v55, %v575_v53  ;;  %v2905_v57 = vpack.c.bf16 %v621_v46, %v620_v47 }
 0x1dd   :  { %v623_v58 = vmul.f32 %v607_v49, %v581_v52 }
 0x1de   :  { %v622_v59 = vmul.f32 %v606_v54, %v576_v56  ;;  %v2726_v60 = vpop.f32.mrb[16].mxu0  ;;  %2906 = vmatprep.subr.bf16.mxu0 %v2905_v57  ;;  %v1997_v31 = vpop.permute.xlu1 %1996 }
 0x1df   :  { %v591_v62 = vadd.f32 %v2726_v60, %v3428_v55  ;;  %v585_v63 = vpop.f32.mrb[17].mxu0  ;;  %2908 = vmatpush3.bf16.msra.mxu0 %v2905_v57  ;;  %v2195_v32 = vpop.permute.xlu0 %2194 }
 0x1e0   :  { %v586_v1 = vadd.f32 %v3428_v55, %v585_v63  ;;  %v2909_v3 = vpack.c.bf16 %v623_v58, %v622_v59 }
 0x1e1   :  { %v625_v4 = vmul.f32 %v609_v61, %v591_v62 }
 0x1e2   :  { %v624_v5 = vmul.f32 %v608_v0, %v586_v1  ;;  %2910 = vmatprep.subr.bf16.mxu0 %v2909_v3 }
 0x1e3   :  { %2912 = vmatpush3.bf16.msra.mxu0 %v2909_v3 }
 0x1e4   :  { %v2913_v6 = vpack.c.bf16 %v625_v4, %v624_v5 }
 0x1e6   :  { %2914 = vmatprep.subr.bf16.mxu0 %v2913_v6 }
 0x1e7   :  { %2916 = vmatpush3.bf16.msra.mxu0 %v2913_v6 }
 0x1e8   :  { %2767 = vmatprep.subr.mxu0 %v3056_v42 }
 0x1ea   :  { %2760 = vmatmul.mubr.f32.vlgmr.msra.gmra.mrb[18].mxu0 %v627_v7 }
 0x1eb   :  { %2769 = vmatprep.mubr.msk.f32.mxu0 %vm3057_vm2, %v3056_v42 }
 0x234   :  { %v3500_v8 = vpop.f32.mrb[16].mxu1 }
 0x235   :  { %v2766_v55 = vpop.f32.mrb[17].mxu1 }
 0x238   :  { %v3502_v9 = vpop.f32.mrb[18].mxu1 }
 0x239   :  { %v2776_v10 = vpop.f32.mrb[19].mxu1 }
 0x23c   :  { %v3504_v11 = vpop.f32.mrb[20].mxu1 }
 0x23d   :  { %v2786_v12 = vpop.f32.mrb[21].mxu1 }
 0x240   :  { %v3506_v13 = vpop.f32.mrb[22].mxu1 }
 0x241   :  { %v2796_v14 = vpop.f32.mrb[23].mxu1 }
 0x242   :  { %v785_v14 = vmul.f32 0.35355338, %v3500_v8 }
 0x244   :  { %v3508_v15 = vpop.f32.mrb[24].mxu1 }
 0x245   :  { %v2806_v16 = vpop.f32.mrb[25].mxu1 }
 0x246   :  { %v977_v16 = vmul.f32 0.35355338, %v3502_v9 }
 0x248   :  { %v3510_v17 = vpop.f32.mrb[26].mxu1 }
 0x249   :  { %v2816_v18 = vpop.f32.mrb[27].mxu1 }
 0x24c   :  { %v3512_v19 = vpop.f32.mrb[28].mxu1 }
 0x24d   :  { %v2826_v20 = vpop.f32.mrb[29].mxu1 }
 0x24e   :  { %v786_v20 = vadd.f32 %v785_v14, %v3375_v41 }
 0x250   :  { %v3514_v21 = vpop.f32.mrb[30].mxu1  ;;  %v3572_v8 = vmul.f32 %v3516_v24, %v786_v20 }
 0x251   :  { %v2836_v22 = vpop.f32.mrb[31].mxu1 }
 0x252   :  { %v1177_v22 = vmul.f32 0.35355338, %v3504_v11 }
 0x2bd   :  { %v3520_v29 = vpop.f32.mrb[18].mxu0 }
 0x2be   :  { %v694_v30 = vpop.f32.mrb[19].mxu0  ;;  %v1801_v36 = vadd.f32 %v3520_v29, %v1799_v27  ;;  %v1999_v39 = vadd.f32 %v3520_v29, %v1997_v31  ;;  %v2197_v40 = vadd.f32 %v3520_v29, %v2195_v32  ;;  %v1178_v27 = vadd.f32 %v1177_v22, %v3375_v41 }
 0x2bf   :  { %v1194_v33 = vadd.f32 %v1192_v26, %v694_v30  ;;  %v995_v34 = vadd.f32 %v993_v23, %v694_v30  ;;  %v1393_v35 = vadd.f32 %v1391_v25, %v694_v30  ;;  %v804_v18 = vadd.f32 %v3375_v41, %v694_v30 }
 0x2c0   :  { %v1802_v46 = vmul.f32 %v1801_v36, %v3518_v28  ;;  %v2000_v49 = vmul.f32 %v1999_v39, %v3518_v28  ;;  %v2198_v52 = vmul.f32 %v2197_v40, %v3518_v28  ;;  %v978_v23 = vadd.f32 %v977_v16, %v3375_v41 }
 0x2c1   :  { %v3524_v37 = vmul.f32 %v1194_v33, %v3516_v24  ;;  %v996_v38 = vmul.f32 %v995_v34, %v3516_v24  ;;  %v3532_v45 = vmul.f32 %v1393_v35, %v3516_v24  ;;  %v1376_v25 = vmul.f32 0.35355338, %v3506_v13 }
 0x2c2   :  { %v1803_v48 = vsel %vm997_vm5, %v1802_v46, -inf  ;;  %v2001_v53 = vsel %vm1196_vm4, %v2000_v49, -inf  ;;  %v2199_v54 = vsel %vm1395_vm6, %v2198_v52, -inf  ;;  %v3567_v26 = vmul.f32 %v804_v18, %v3516_v24 }
 0x2c3   :  { %v1197_v43 = vsel %vm1196_vm4, %v3524_v37, -inf  ;;  %v998_v44 = vsel %vm997_vm5, %v996_v38, -inf  ;;  %v1396_v47 = vsel %vm1395_vm6, %v3532_v45, -inf  ;;  %v1591_v31 = vmul.f32 0.35355338, %v3508_v15 }
 0x2c4   :  { %1198 = vmax.xlane.f32.xlu0 %v1197_v43  ;;  %999 = vmax.xlane.f32.xlu1 %v998_v44  ;;  %v1377_v9 = vadd.f32 %v1376_v25, %v3375_v41  ;;  %v806_v30 = vsel %vm710_vm3, %v3567_v26, -inf  ;;  %v3578_v11 = vmul.f32 %v978_v23, %v3516_v24  ;;  %v1783_v32 = vmul.f32 0.35355338, %v3510_v17 }
 0x2c5   :  { %v1592_v13 = vadd.f32 %v1591_v31, %v3406_v50  ;;  %v793_v33 = vsel %vm710_vm3, %v3572_v8, -inf  ;;  %v3585_v15 = vmul.f32 %v1178_v27, %v3516_v24  ;;  %v1982_v41 = vmul.f32 0.35355338, %v3512_v19 }
 0x2c6   :  { %v980_v34 = vsel %vm710_vm3, %v3578_v11, -inf  ;;  %v3591_v35 = vmul.f32 %v1377_v9, %v3516_v24  ;;  %v1610_v36 = vadd.f32 %v3520_v29, %v3406_v50  ;;  %v1784_v17 = vadd.f32 %v1783_v32, %v3406_v50 }
 0x2c7   :  { %v1180_v39 = vsel %vm710_vm3, %v3585_v15, -inf  ;;  %v3600_v40 = vmul.f32 %v3518_v28, %v1592_v13  ;;  %v1983_v19 = vadd.f32 %v1982_v41, %v3406_v50 }
 0x2c8   :  { %1397 = vmax.xlane.f32.xlu0 %v1396_v47  ;;  %1804 = vmax.xlane.f32.xlu1 %v1803_v48  ;;  %v1379_v24 = vsel %vm710_vm3, %v3591_v35, -inf  ;;  %v3606_v43 = vmul.f32 %v1610_v36, %v3518_v28  ;;  %v3612_v44 = vmul.f32 %v1784_v17, %v3518_v28 }
 0x2c9   :  { %v3617_v47 = vmul.f32 %v1983_v19, %v3518_v28 }
 0x2ca   :  { %v1786_v48 = vsel %vm710_vm3, %v3612_v44, -inf }
 0x2cc   :  { %2002 = vmax.xlane.f32.xlu0 %v2001_v53  ;;  %2200 = vmax.xlane.f32.xlu1 %v2199_v54 }
 0x351   :  { %v1000_v56 = vpop.xlane.xlu1 %999  ;;  %v3539_v57 = vpop.xlane.xlu0 %1198 }
 0x352   :  { %v1001_v60 = vsub.f32 %v996_v38, %v1000_v56  ;;  %v2180_v38 = vmul.f32 0.35355338, %v3514_v21  ;;  %v1599_v21 = vsel %vm710_vm3, %v3600_v40, -inf }
 0x354   :  { %v1002_v1 = vmul.f32 1.442695, %v1001_v60  ;;  %v2181_v29 = vadd.f32 %v2180_v38, %v3406_v50  ;;  %v1985_v50 = vsel %vm710_vm3, %v3617_v47, -inf }
 0x355   :  { %v1805_v58 = vpop.xlane.xlu1 %1804  ;;  %v3541_v59 = vpop.xlane.xlu0 %1397 }
 0x356   :  { %v1806_v61 = vsub.f32 %v1802_v46, %v1805_v58  ;;  %v1612_v46 = vsel %vm710_vm3, %v3606_v43, -inf  ;;  %v1399_v56 = vsub.f32 %v3532_v45, %v3541_v59 }
 0x358   :  { %v1807_v62 = vmul.f32 1.442695, %v1806_v61  ;;  %v1400_v58 = vmul.f32 1.442695, %v1399_v56 }
 0x359   :  { %v2201_v63 = vpop.xlane.xlu1 %2200  ;;  %v2003_v0 = vpop.xlane.xlu0 %2002 }
 0x35a   :  { %2946 = vpow2.f32 %v1807_v62  ;;  %v2202_v3 = vsub.f32 %v2198_v52, %v2201_v63  ;;  %v2004_v4 = vsub.f32 %v2000_v49, %v2003_v0  ;;  %v3622_v49 = vmul.f32 %v2181_v29, %v3518_v28 }
 0x35b   :  { %2948 = vpow2.f32 %v1002_v1  ;;  %v1200_v52 = vsub.f32 %v3524_v37, %v3539_v57 }
 0x35c   :  { %v2005_v5 = vmul.f32 1.442695, %v2004_v4  ;;  %v2203_v6 = vmul.f32 1.442695, %v2202_v3  ;;  %v2183_v53 = vsel %vm710_vm3, %v3622_v49, -inf }
 0x35d   :  { %v1201_v54 = vmul.f32 1.442695, %v1200_v52 }
 0x35e   :  { %2950 = vpow2.f32 %v2005_v5 }
 0x35f   :  { %2952 = vpow2.f32 %v2203_v6 }
 0x360   :  { %2954 = vpow2.f32 %v1201_v54 }
 0x361   :  { %2956 = vpow2.f32 %v1400_v58 }
 0x364   :  { %v3543_v7 = vpop.eup %2946 }
 0x365   :  { %1810 = vrot.lane.b32.xlu0 %v3543_v7, %s3059_s7  ;;  %v3547_v55 = vpop.eup %2948 }
 0x368   :  { %v3549_v10 = vpop.eup %2950 }
 0x369   :  { %1005 = vrot.lane.b32.xlu0 %v3547_v55, %s3059_s7  ;;  %2008 = vrot.lane.b32.xlu1 %v3549_v10, %s3062_s30  ;;  %v3555_v12 = vpop.eup %2952 }
 0x36a   :  { %v3632_v28 = vpop.eup %2954 }
 0x36b   :  { %v3636_v60 = vpop.eup %2956 }
 0x36d   :  { %2206 = vrot.lane.b32.xlu0 %v3555_v12, %s3064_s6 }
 0x38c   :  { %807 = vmax.xlane.f32.xlu0 %v806_v30 }
 0x38d   :  { %794 = vmax.xlane.f32.xlu1 %v793_v33 }
 0x390   :  { %981 = vmax.xlane.f32.xlu0 %v980_v34 }
 0x391   :  { %1181 = vmax.xlane.f32.xlu1 %v1180_v39 }
 0x394   :  { %1380 = vmax.xlane.f32.xlu0 %v1379_v24 }
 0x395   :  { %1600 = vmax.xlane.f32.xlu1 %v1599_v21 }
 0x398   :  { %1613 = vmax.xlane.f32.xlu0 %v1612_v46 }
 0x399   :  { %1787 = vmax.xlane.f32.xlu1 %v1786_v48 }
 0x39c   :  { %1986 = vmax.xlane.f32.xlu0 %v1985_v50 }
 0x39d   :  { %2184 = vmax.xlane.f32.xlu1 %v2183_v53 }
 0x3ae   :  { %1204 = vrot.lane.b32.xlu1 %v3632_v28, %s3062_s30 }
 0x3b2   :  { %1403 = vrot.lane.b32.xlu1 %v3636_v60, %s3064_s6 }
 0x3d7   :  { %v1811_v37 = vpop.permute.xlu0 %1810 }
 0x3d8   :  { %v1813_v34 = vsel %vm710_vm3, %v1811_v37, 0.0 }
 0x3db   :  { %v1006_v57 = vpop.permute.xlu0 %1005  ;;  %v2009_v62 = vpop.permute.xlu1 %2008 }
 0x3dc   :  { %v1008_v61 = vsel %vm710_vm3, %v1006_v57, 0.0  ;;  %v2011_v19 = vsel %vm710_vm3, %v2009_v62, 0.0 }
 0x3dd   :  { %1009 = vadd.xlane.f32.xlu0 %v1008_v61 }
 0x3df   :  { %v2207_v45 = vpop.permute.xlu0 %2206 }
 0x3e0   :  { %v2209_v24 = vsel %vm710_vm3, %v2207_v45, 0.0 }
 0x419   :  { %v808_v59 = vpop.xlane.xlu0 %807 }
 0x41a   :  { %v795_v63 = vpop.xlane.xlu1 %794  ;;  %v809_v4 = vsub.f32 %v3567_v26, %v808_v59 }
 0x41b   :  { %v796_v5 = vsub.f32 %v3572_v8, %v795_v63 }
 0x41c   :  { %v810_v16 = vmul.f32 1.442695, %v809_v4 }
 0x41d   :  { %v982_v1 = vpop.xlane.xlu0 %981  ;;  %v797_v20 = vmul.f32 1.442695, %v796_v5 }
 0x41e   :  { %v1182_v0 = vpop.xlane.xlu1 %1181  ;;  %v983_v18 = vsub.f32 %v3578_v11, %v982_v1  ;;  %2958 = vpow2.f32 %v810_v16 }
 0x41f   :  { %v1183_v22 = vsub.f32 %v3585_v15, %v1182_v0  ;;  %2960 = vpow2.f32 %v797_v20 }
 0x420   :  { %v984_v27 = vmul.f32 1.442695, %v983_v18 }
 0x421   :  { %v1381_v6 = vpop.xlane.xlu0 %1380  ;;  %v1184_v9 = vmul.f32 1.442695, %v1183_v22 }
 0x422   :  { %v1601_v3 = vpop.xlane.xlu1 %1600  ;;  %v1382_v31 = vsub.f32 %v3591_v35, %v1381_v6  ;;  %2962 = vpow2.f32 %v984_v27 }
 0x423   :  { %v1602_v26 = vsub.f32 %v3600_v40, %v1601_v3  ;;  %2964 = vpow2.f32 %v1184_v9 }
 0x424   :  { %v1383_v13 = vmul.f32 1.442695, %v1382_v31 }
 0x425   :  { %v1614_v25 = vpop.xlane.xlu0 %1613  ;;  %v1603_v32 = vmul.f32 1.442695, %v1602_v26 }
 0x426   :  { %v1788_v14 = vpop.xlane.xlu1 %1787  ;;  %v1615_v11 = vsub.f32 %v3606_v43, %v1614_v25  ;;  %2966 = vpow2.f32 %v1383_v13 }
 0x427   :  { %v1789_v33 = vsub.f32 %v3612_v44, %v1788_v14  ;;  %2968 = vpow2.f32 %v1603_v32 }
 0x428   :  { %v1616_v36 = vmul.f32 1.442695, %v1615_v11  ;;  %v3654_v40 = vpop.eup %2958 }
 0x429   :  { %v1987_v15 = vpop.xlane.xlu0 %1986  ;;  %v1790_v38 = vmul.f32 1.442695, %v1789_v33  ;;  %v3658_v43 = vpop.eup %2960 }
 0x42a   :  { %v2185_v23 = vpop.xlane.xlu1 %2184  ;;  %v1988_v17 = vsub.f32 %v3617_v47, %v1987_v15  ;;  %2970 = vpow2.f32 %v1616_v36  ;;  %v799_v46 = vsel %vm710_vm3, %v3658_v43, 0.0  ;;  %v812_v47 = vsel %vm710_vm3, %v3654_v40, 0.0 }
 0x42b   :  { %v2186_v39 = vsub.f32 %v3622_v49, %v2185_v23  ;;  %2972 = vpow2.f32 %v1790_v38 }
 0x42c   :  { %v1989_v29 = vmul.f32 1.442695, %v1988_v17  ;;  %v3660_v44 = vpop.eup %2962 }
 0x42d   :  { %v2187_v21 = vmul.f32 1.442695, %v2186_v39  ;;  %v3666_v48 = vpop.eup %2964  ;;  %v986_v52 = vsel %vm710_vm3, %v3660_v44, 0.0 }
 0x42e   :  { %v1205_v30 = vpop.permute.xlu1 %1204  ;;  %2974 = vpow2.f32 %v1989_v29  ;;  %v1186_v50 = vsel %vm710_vm3, %v3666_v48, 0.0 }
 0x42f   :  { %v1207_v8 = vsel %vm710_vm3, %v1205_v30, 0.0  ;;  %2976 = vpow2.f32 %v2187_v21 }
 0x430   :  { %1208 = vadd.xlane.f32.xlu1 %v1207_v8  ;;  %v3668_v49 = vpop.eup %2966 }
 0x431   :  { %v2969_v53 = vpop.eup %2968  ;;  %v1385_v58 = vsel %vm710_vm3, %v3668_v49, 0.0 }
 0x432   :  { %v1404_v41 = vpop.permute.xlu1 %1403  ;;  %v1605_v56 = vsel %vm710_vm3, %v2969_v53, 0.0 }
 0x433   :  { %v1406_v35 = vsel %vm710_vm3, %v1404_v41, 0.0 }
 0x434   :  { %1814 = vadd.xlane.f32.xlu1 %v1813_v34  ;;  %1407 = vadd.xlane.f32.xlu0 %v1406_v35  ;;  %v2971_v54 = vpop.eup %2970 }
 0x435   :  { %v3677_v37 = vpop.eup %2972  ;;  %v1618_v62 = vsel %vm710_vm3, %v2971_v54, 0.0 }
 0x436   :  { %v1792_v61 = vsel %vm710_vm3, %v3677_v37, 0.0 }
 0x438   :  { %2012 = vadd.xlane.f32.xlu0 %v2011_v19  ;;  %2210 = vadd.xlane.f32.xlu1 %v2209_v24  ;;  %v3679_v57 = vpop.eup %2974 }
 0x439   :  { %v3684_v45 = vpop.eup %2976  ;;  %v1991_v63 = vsel %vm710_vm3, %v3679_v57, 0.0 }
 0x43a   :  { %v2189_v59 = vsel %vm710_vm3, %v3684_v45, 0.0 }
 0x43c   :  { %800 = vadd.xlane.f32.xlu0 %v799_v46  ;;  %813 = vadd.xlane.f32.xlu1 %v812_v47 }
 0x440   :  { %1187 = vadd.xlane.f32.xlu1 %v1186_v50  ;;  %987 = vadd.xlane.f32.xlu0 %v986_v52 }
 0x444   :  { %1606 = vadd.xlane.f32.xlu1 %v1605_v56  ;;  %1386 = vadd.xlane.f32.xlu0 %v1385_v58 }
 0x448   :  { %1793 = vadd.xlane.f32.xlu1 %v1792_v61  ;;  %1619 = vadd.xlane.f32.xlu0 %v1618_v62 }
 0x44c   :  { %2190 = vadd.xlane.f32.xlu1 %v2189_v59  ;;  %1992 = vadd.xlane.f32.xlu0 %v1991_v63 }
 0x46a   :  { %v1010_v0 = vpop.xlane.xlu0 %1009 }
 0x46b   :  { %2978 = vrcp.f32 %v1010_v0 }
 0x475   :  { %v2979_v1 = vpop.eup %2978 }
 0x476   :  { %v1012_v3 = vmul.f32 %v2979_v1, %v3547_v55 }
 0x478   :  { %1014 = vrot.lane.b32.xlu0 %v1012_v3, %s3059_s7 }
 0x4bd   :  { %v1209_v4 = vpop.xlane.xlu1 %1208 }
 0x4c1   :  { %v1815_v5 = vpop.xlane.xlu1 %1814  ;;  %v1408_v6 = vpop.xlane.xlu0 %1407 }
 0x4c2   :  { %2980 = vrcp.f32 %v1815_v5 }
 0x4c5   :  { %v2211_v14 = vpop.xlane.xlu1 %2210  ;;  %v2013_v16 = vpop.xlane.xlu0 %2012 }
 0x4c6   :  { %2982 = vrcp.f32 %v2211_v14 }
 0x4c7   :  { %2984 = vrcp.f32 %v2013_v16 }
 0x4c9   :  { %v801_v18 = vpop.xlane.xlu0 %800  ;;  %v814_v25 = vpop.xlane.xlu1 %813 }
 0x4cc   :  { %v2981_v20 = vpop.eup %2980 }
 0x4cd   :  { %v988_v22 = vpop.xlane.xlu0 %987  ;;  %v1817_v23 = vmul.f32 %v2981_v20, %v3543_v7  ;;  %v3700_v30 = vpop.xlane.xlu1 %1187 }
 0x4cf   :  { %1819 = vrot.lane.b32.xlu0 %v1817_v23, %s3059_s7  ;;  %s3071_s7 = smov 40  }
 0x4d0   :  { %v2983_v27 = vpop.eup %2982 }
 0x4d1   :  { %v2985_v55 = vpop.eup %2984  ;;  %v2213_v31 = vmul.f32 %v2983_v27, %v3555_v12  ;;  %v3696_v26 = vpop.xlane.xlu0 %1386 }
 0x4d2   :  { %v2015_v9 = vmul.f32 %v2985_v55, %v3549_v10  ;;  %v1607_v13 = vpop.xlane.xlu1 %1606 }
 0x4d3   :  { %2215 = vrot.lane.b32.xlu0 %v2213_v31, %s3064_s6 }
 0x4d4   :  { %2017 = vrot.lane.b32.xlu1 %v2015_v9, %s3062_s30 }
 0x4d5   :  { %v1620_v8 = vpop.xlane.xlu0 %1619 }
 0x4d6   :  { %2986 = vrcp.f32 %v1620_v8  ;;  %v1794_v24 = vpop.xlane.xlu1 %1793 }
 0x4d7   :  { %2988 = vrcp.f32 %v1607_v13 }
 0x4d8   :  { %2990 = vrcp.f32 %v814_v25 }
 0x4d9   :  { %2992 = vrcp.f32 %v801_v18 }
 0x4da   :  { %2994 = vrcp.f32 %v1209_v4  ;;  %v2191_v29 = vpop.xlane.xlu1 %2190 }
 0x4db   :  { %2996 = vrcp.f32 %v1408_v6 }
 0x4dc   :  { %2998 = vrcp.f32 %v1794_v24 }
 0x4e0   :  { %v2987_v7 = vpop.eup %2986 }
 0x4e1   :  { %v2989_v11 = vpop.eup %2988  ;;  %v1622_v32 = vmul.f32 %v2987_v7, %v2971_v54 }
 0x4e2   :  { %v2991_v12 = vpop.eup %2990  ;;  %v1609_v33 = vmul.f32 %v2989_v11, %v2969_v53 }
 0x4e3   :  { %v2993_v10 = vpop.eup %2992  ;;  %v816_v34 = vmul.f32 %v2991_v12, %v3654_v40 }
 0x4e4   :  { %v3702_v15 = vadd.f32 %v1622_v32, %v1609_v33  ;;  %v803_v41 = vmul.f32 %v2993_v10, %v3658_v43  ;;  %v2995_v38 = vpop.eup %2994  ;;  %v1993_v43 = vpop.xlane.xlu0 %1992 }
 0x4e5   :  { %v1211_v39 = vmul.f32 %v2995_v38, %v3632_v28  ;;  %v2997_v40 = vpop.eup %2996  ;;  %3000 = vrcp.f32 %v1993_v43 }
 0x4e6   :  { %v1624_v35 = vsel %vm710_vm3, %v3702_v15, 0.0  ;;  %v3708_v36 = vadd.f32 %v816_v34, %v803_v41  ;;  %v1410_v19 = vmul.f32 %v2997_v40, %v3636_v60  ;;  %3002 = vrcp.f32 %v2191_v29  ;;  %v2999_v21 = vpop.eup %2998 }
 0x4e7   :  { %3004 = vrcp.f32 %v988_v22  ;;  %v1796_v47 = vmul.f32 %v2999_v21, %v3677_v37 }
 0x4e8   :  { %v818_v17 = vsel %vm710_vm3, %v3708_v36, 0.0  ;;  %3006 = vrcp.f32 %v3700_v30 }
 0x4e9   :  { %3008 = vrcp.f32 %v3696_v26 }
 0x4ea   :  { %v1015_v46 = vpop.permute.xlu0 %1014 }
 0x4ef   :  { %v3001_v28 = vpop.eup %3000 }
 0x4f0   :  { %v3003_v53 = vpop.eup %3002  ;;  %v1995_v54 = vmul.f32 %v3001_v28, %v3679_v57  ;;  %v2316_v28 = vld [vmem:[%s3855_s12 + $0x8] sm:$0xff] }
 0x4f1   :  { %v2193_v62 = vmul.f32 %v3003_v53, %v3684_v45  ;;  %v3005_v59 = vpop.eup %3004 }
 0x4f2   :  { %1625 = vadd.xlane.f32.xlu0 %v1624_v35  ;;  %v990_v0 = vmul.f32 %v3005_v59, %v3660_v44  ;;  %v3007_v45 = vpop.eup %3006 }
 0x4f3   :  { %v1190_v5 = vmul.f32 %v3007_v45, %v3666_v48  ;;  %v3009_v6 = vpop.eup %3008 }
 0x4f4   :  { %v1017_v1 = vadd.f32 %v1015_v46, %v990_v0  ;;  %v1389_v20 = vmul.f32 %v3009_v6, %v3668_v49 }
 0x4f6   :  { %v1018_v3 = vsel %vm710_vm3, %v1017_v1, 0.0 }
 0x4f8   :  { %819 = vadd.xlane.f32.xlu1 %v818_v17 }
 0x509   :  { %823 = vrot.lane.b32.xlu1 %v3293_v51, %s3069_s10 }
 0x50d   :  { %1213 = vrot.lane.b32.xlu1 %v1211_v39, %s3062_s30  ;;  %s3072_s30 = smov 56  }
 0x511   :  { %1412 = vrot.lane.b32.xlu1 %v1410_v19, %s3064_s6 }
 0x541   :  { %v1820_v50 = vpop.permute.xlu0 %1819 }
 0x542   :  { %v3719_v52 = vadd.f32 %v1820_v50, %v1796_v47  ;;  %v2315_v50 = vld [vmem:[%s3855_s12] sm:$0xff] }
 0x544   :  { %v1823_v60 = vsel %vm710_vm3, %v3719_v52, 0.0 }
 0x545   :  { %1824 = vadd.xlane.f32.xlu1 %v1823_v60  ;;  %v2216_v58 = vpop.permute.xlu0 %2215  ;;  %v2317_v60 = vld [vmem:[%s3855_s12 + $0x10] sm:$0xff] }
 0x546   :  { %v2018_v56 = vpop.permute.xlu1 %2017  ;;  %v3727_v63 = vadd.f32 %v2216_v58, %v2193_v62 }
 0x547   :  { %v3724_v61 = vadd.f32 %v2018_v56, %v1995_v54  ;;  %v2318_v54 = vld [vmem:[%s3855_s12 + $0x18] sm:$0xff] }
 0x548   :  { %v2219_v57 = vsel %vm710_vm3, %v3727_v63, 0.0  ;;  %v2921_v58 = vpack.c.bf16 %v2318_v54, %v2317_v60 }
 0x549   :  { %v2021_v37 = vsel %vm710_vm3, %v3724_v61, 0.0 }
 0x54a   :  { %2022 = vadd.xlane.f32.xlu0 %v2021_v37 }
 0x54e   :  { %2220 = vadd.xlane.f32.xlu0 %v2219_v57 }
 0x552   :  { %1019 = vadd.xlane.f32.xlu0 %v1018_v3 }
 0x556   :  { %1222 = vrot.lane.b32.xlu1 %v3293_v51, %s3070_s11 }
 0x55a   :  { %1421 = vrot.lane.b32.xlu1 %v3293_v51, %s3071_s7 }
 0x57f   :  { %v1626_v48 = vpop.xlane.xlu0 %1625 }
 0x585   :  { %v820_v44 = vpop.xlane.xlu1 %819 }
 0x586   :  { %3010 = vrcp.f32 %v820_v44 }
 0x589   :  { %v824_v4 = vpop.permute.xlu1 %823 }
 0x58a   :  { %2768 = vmatpush3.msra.mxu0 %v824_v4 }
 0x58b   :  { %2777 = vmatprep.subr.mxu0 %v3056_v42 }
 0x58d   :  { %v1214_v14 = vpop.permute.xlu1 %1213 }
 0x58e   :  { %v1216_v16 = vadd.f32 %v1214_v14, %v1190_v5 }
 0x590   :  { %v3011_v18 = vpop.eup %3010  ;;  %v1217_v22 = vsel %vm710_vm3, %v1216_v16, 0.0 }
 0x591   :  { %v822_v23 = vmul.f32 %v3011_v18, %v3708_v36  ;;  %v1413_v25 = vpop.permute.xlu1 %1412  ;;  %1218 = vadd.xlane.f32.xlu0 %v1217_v22 }
 0x592   :  { %v1415_v27 = vadd.f32 %v1413_v25, %v1389_v20 }
 0x593   :  { %2770 = vmatmul.mubr.msk.f32.vlgmr.msra.gmra.mrb[20].mxu0 %vm710_vm3, %v822_v23 }
 0x594   :  { %v1416_v55 = vsel %vm710_vm3, %v1415_v27, 0.0  ;;  %2779 = vmatprep.mubr.msk.f32.mxu0 %vm3057_vm2, %v3056_v42 }
 0x595   :  { %1417 = vadd.xlane.f32.xlu1 %v1416_v55 }
 0x5a6   :  { %1629 = vrot.lane.b32.xlu1 %v3311_v2, %s3069_s10 }
 0x5a7   :  { %1023 = vrot.lane.b32.xlu0 %v3293_v51, %s3072_s30 }
 0x5aa   :  { %2026 = vrot.lane.b32.xlu1 %v3311_v2, %s3070_s11 }
 0x5ab   :  { %1828 = vrot.lane.b32.xlu0 %v3311_v2, %s3072_s30 }
 0x5af   :  { %2224 = vrot.lane.b32.xlu0 %v3311_v2, %s3071_s7 }
 0x5d2   :  { %v1825_v9 = vpop.xlane.xlu1 %1824 }
 0x5d6   :  { %v1223_v30 = vpop.permute.xlu1 %1222 }
 0x5d7   :  { %v2023_v49 = vpop.xlane.xlu0 %2022 }
 0x5da   :  { %v1422_v8 = vpop.permute.xlu1 %1421 }
 0x5db   :  { %v2221_v31 = vpop.xlane.xlu0 %2220 }
 0x5df   :  { %v1020_v26 = vpop.xlane.xlu0 %1019 }
 0x5e0   :  { %3012 = vrcp.f32 %v1020_v26 }
 0x5ea   :  { %v3013_v7 = vpop.eup %3012 }
 0x5eb   :  { %v1022_v51 = vmul.f32 %v3013_v7, %v1017_v1 }
 0x61e   :  { %v1219_v13 = vpop.xlane.xlu0 %1218 }
 0x61f   :  { %3014 = vrcp.f32 %v1219_v13 }
 0x622   :  { %v1418_v11 = vpop.xlane.xlu1 %1417  ;;  %v1024_v32 = vpop.permute.xlu0 %1023 }
 0x623   :  { %3016 = vrcp.f32 %v1418_v11  ;;  %2778 = vmatpush3.msra.mxu0 %v1024_v32 }
 0x624   :  { %2780 = vmatmul.mubr.msk.f32.vlgmr.msra.gmra.mrb[22].mxu0 %vm710_vm3, %v1022_v51  ;;  %2787 = vmatprep.subr.mxu0 %v3056_v42  ;;  %3018 = vrcp.f32 %v1626_v48 }
 0x625   :  { %2788 = vmatpush3.msra.mxu0 %v1223_v30  ;;  %2789 = vmatprep.mubr.msk.f32.mxu0 %vm3057_vm2, %v3056_v42  ;;  %3020 = vrcp.f32 %v1825_v9  ;;  %v3030_v9 = vld [vmem:[%s3862_s18 + $0x8] sm:$0xff]  ;;  %v3031_v30 = vld [vmem:[%s3862_s18] sm:$0xff] }
 0x626   :  { %2797 = vmatprep.subr.mxu0 %v3056_v42  ;;  %3022 = vrcp.f32 %v2023_v49  ;;  %v1630_v34 = vpop.permute.xlu1 %1629  ;;  %v1829_v17 = vpop.permute.xlu0 %1828 }
 0x627   :  { %3024 = vrcp.f32 %v2221_v31 }
 0x629   :  { %v3015_v2 = vpop.eup %3014 }
 0x62a   :  { %v1221_v12 = vmul.f32 %v3015_v2, %v1216_v16  ;;  %v2027_v40 = vpop.permute.xlu1 %2026  ;;  %v2225_v24 = vpop.permute.xlu0 %2224 }
 0x62c   :  { %2790 = vmatmul.mubr.msk.f32.vlgmr.msra.gmra.mrb[24].mxu0 %vm710_vm3, %v1221_v12 }
 0x62d   :  { %v3017_v33 = vpop.eup %3016  ;;  %2798 = vmatpush3.msra.mxu0 %v1422_v8  ;;  %2799 = vmatprep.mubr.msk.f32.mxu0 %vm3057_vm2, %v3056_v42 }
 0x62e   :  { %v1420_v10 = vmul.f32 %v3017_v33, %v1415_v27  ;;  %2807 = vmatprep.subr.mxu0 %v3056_v42  ;;  %v3019_v41 = vpop.eup %3018  ;;  %v2533_v27 = vld [vmem:[%s3856_s13] ss:$0 sm:$0xff] }
 0x62f   :  { %v1628_v35 = vmul.f32 %v3019_v41, %v3702_v15  ;;  %v3021_v36 = vpop.eup %3020 }
 0x630   :  { %2800 = vmatmul.mubr.msk.f32.vlgmr.msra.gmra.mrb[26].mxu0 %vm710_vm3, %v1420_v10  ;;  %v1827_v38 = vmul.f32 %v3021_v36, %v3719_v52  ;;  %v3023_v39 = vpop.eup %3022 }
 0x631   :  { %2808 = vmatpush3.msra.mxu0 %v1630_v34  ;;  %2809 = vmatprep.mubr.msk.f32.mxu0 %vm3057_vm2, %v3056_v42  ;;  %v2025_v15 = vmul.f32 %v3023_v39, %v3724_v61  ;;  %v3025_v19 = vpop.eup %3024 }
 0x632   :  { %2817 = vmatprep.subr.mxu0 %v3056_v42  ;;  %v2223_v43 = vmul.f32 %v3025_v19, %v3727_v63 }
 0x634   :  { %2810 = vmatmul.mubr.msk.f32.vlgmr.msra.gmra.mrb[28].mxu0 %vm710_vm3, %v1628_v35 }
 0x635   :  { %2818 = vmatpush3.msra.mxu0 %v1829_v17  ;;  %2819 = vmatprep.mubr.msk.f32.mxu0 %vm3057_vm2, %v3056_v42 }
 0x636   :  { %2827 = vmatprep.subr.mxu0 %v3056_v42 }
 0x638   :  { %2820 = vmatmul.mubr.msk.f32.vlgmr.msra.gmra.mrb[30].mxu0 %vm710_vm3, %v1827_v38 }
 0x639   :  { %2828 = vmatpush3.msra.mxu0 %v2027_v40  ;;  %2829 = vmatprep.mubr.msk.f32.mxu0 %vm3057_vm2, %v3056_v42 }
 0x63a   :  { %2837 = vmatprep.subr.mxu0 %v3056_v42 }
 0x63c   :  { %2830 = vmatmul.mubr.msk.f32.vlgmr.msra.gmra.mrb[32].mxu0 %vm710_vm3, %v2025_v15 }
 0x63d   :  { %2838 = vmatpush3.msra.mxu0 %v2225_v24  ;;  %2839 = vmatprep.mubr.msk.f32.mxu0 %vm3057_vm2, %v3056_v42  ;;  %v2917_v42 = vpack.c.bf16 %v2316_v28, %v2315_v50  ;;  %v2536_v24 = vld [vmem:[%s3857_s14] ss:$0 sm:$0xff] }
 0x63f   :  { %2918 = vmatprep.subr.bf16.mxu1 %v2917_v42 }
 0x640   :  { %2840 = vmatmul.mubr.msk.f32.vlgmr.msra.gmra.mrb[34].mxu0 %vm710_vm3, %v2223_v43  ;;  %2920 = vmatpush3.bf16.msra.mxu1 %v2917_v42 }
 0x641   :  { %2922 = vmatprep.subr.bf16.mxu1 %v2921_v58 }
 0x644   :  { %2924 = vmatpush3.bf16.msra.mxu1 %v2921_v58 }
 0x666   :  { %v895_v29 = vpop.f32.mrb[20].mxu0 }
 0x667   :  { %v2771_v21 = vpop.f32.mrb[21].mxu0 }
 0x6f7   :  { %v1095_v46 = vpop.f32.mrb[22].mxu0 }
 0x6f8   :  { %1498 = vrot.lane.b32.xlu1 %v1095_v46, %s3065_s23  ;;  %v2781_v47 = vpop.f32.mrb[23].mxu0  ;;  %v2537_v46 = vld [vmem:[%s3858_s15] ss:$0 sm:$0xff] }
 0x6ff   :  { %v1294_v52 = vpop.f32.mrb[24].mxu0 }
 0x700   :  { %1502 = vrot.lane.b32.xlu0 %v1294_v52, %s3067_s24  ;;  %v2791_v53 = vpop.f32.mrb[25].mxu0 }
 0x703   :  { %v1493_v56 = vpop.f32.mrb[26].mxu0 }
 0x704   :  { %1506 = vrot.lane.b32.xlu1 %v1493_v56, %s3068_s26  ;;  %v2801_v61 = vpop.f32.mrb[27].mxu0 }
 0x707   :  { %v1701_v62 = vpop.f32.mrb[28].mxu0 }
 0x708   :  { %v2811_v59 = vpop.f32.mrb[29].mxu0 }
 0x70b   :  { %v1900_v63 = vpop.f32.mrb[30].mxu0 }
 0x70c   :  { %2301 = vrot.lane.b32.xlu0 %v1900_v63, %s3065_s23  ;;  %v2821_v37 = vpop.f32.mrb[31].mxu0 }
 0x70f   :  { %v2098_v0 = vpop.f32.mrb[32].mxu0 }
 0x710   :  { %2305 = vrot.lane.b32.xlu1 %v2098_v0, %s3067_s24  ;;  %v2831_v1 = vpop.f32.mrb[33].mxu0 }
 0x713   :  { %v2296_v57 = vpop.f32.mrb[34].mxu0 }
 0x714   :  { %2309 = vrot.lane.b32.xlu0 %v2296_v57, %s3068_s26  ;;  %v2841_v3 = vpop.f32.mrb[35].mxu0 }
 0x76a   :  { %v1499_v44 = vpop.permute.xlu1 %1498 }
 0x76b   :  { %v1509_v4 = vsel %vm710_vm3, %v895_v29, %v1499_v44 }
 0x772   :  { %v1503_v45 = vpop.permute.xlu0 %1502 }
 0x773   :  { %v1511_v5 = vsel %vm1510_vm7, %v1509_v4, %v1503_v45 }
 0x776   :  { %v1507_v6 = vpop.permute.xlu1 %1506 }
 0x777   :  { %v1513_v14 = vsel %vm1512_vm8, %v1511_v5, %v1507_v6 }
 0x778   :  { %2850 = vmatprep.mubr.msk.f32.mxu1 %vm67_vm1, %v1513_v14 }
 0x77e   :  { %v2302_v16 = vpop.permute.xlu0 %2301 }
 0x77f   :  { %v2312_v20 = vsel %vm710_vm3, %v1701_v62, %v2302_v16 }
 0x782   :  { %v2306_v18 = vpop.permute.xlu1 %2305 }
 0x783   :  { %v2313_v22 = vsel %vm1510_vm7, %v2312_v20, %v2306_v18 }
 0x786   :  { %v2310_v23 = vpop.permute.xlu0 %2309 }
 0x787   :  { %v2314_v25 = vsel %vm1512_vm8, %v2313_v22, %v2310_v23 }
 0x788   :  { %2851 = vmatmul.mubr.msk.f32.vlgmr.msra.gmra.mrb[32].mxu1 %vm67_vm1, %v2314_v25 }
 0x85b   :  { %v2852_v55 = vpop.f32.mrb[32].mxu1 }
 0x85c   :  { %v2404_v48 = vadd.f32 %v2852_v55, %v2533_v27  ;;  %v2398_v49 = vpop.f32.mrb[33].mxu1 }
 0x85d   :  { %v2399_v31 = vadd.f32 %v2533_v27, %v2398_v49 }
 0x85e   :  { %v2408_v26 = vadd.f32 %v3030_v9, %v2404_v48 }
 0x85f   :  { %v2407_v8 = vadd.f32 %v3031_v30, %v2399_v31 }
 0x860   :  { %v2412_v13 = vsel %vm67_vm1, %v2408_v26, 0.0 }
 0x861   :  { %2413 = vadd.xlane.f32.xlu0 %v2412_v13  ;;  %v2409_v7 = vsel %vm67_vm1, %v2407_v8, 0.0 }
 0x862   :  { %2410 = vadd.xlane.f32.xlu1 %v2409_v7 }
 0x8ee   :  { %v2414_v51 = vpop.xlane.xlu0 %2413 }
 0x8ef   :  { %v2417_v11 = vmul.f32 0.03125, %v2414_v51  ;;  %v2411_v32 = vpop.xlane.xlu1 %2410 }
 0x8f0   :  { %v2416_v2 = vmul.f32 0.03125, %v2411_v32 }
 0x8f1   :  { %v2419_v12 = vsub.f32 %v2408_v26, %v2417_v11 }
 0x8f2   :  { %v2418_v33 = vsub.f32 %v2407_v8, %v2416_v2 }
 0x8f3   :  { %v2421_v10 = vmul.f32 %v2419_v12, %v2419_v12 }
 0x8f4   :  { %v2420_v41 = vmul.f32 %v2418_v33, %v2418_v33 }
 0x8f5   :  { %v2425_v34 = vsel %vm67_vm1, %v2421_v10, 0.0 }
 0x8f6   :  { %2426 = vadd.xlane.f32.xlu1 %v2425_v34  ;;  %v2422_v35 = vsel %vm67_vm1, %v2420_v41, 0.0 }
 0x8f7   :  { %2423 = vadd.xlane.f32.xlu0 %v2422_v35 }
 0x983   :  { %v2427_v36 = vpop.xlane.xlu1 %2426 }
 0x984   :  { %v2429_v17 = vmul.f32 0.03125, %v2427_v36  ;;  %v2424_v38 = vpop.xlane.xlu0 %2423 }
 0x985   :  { %v2428_v39 = vmul.f32 0.03125, %v2424_v38 }
 0x986   :  { %v2431_v40 = vadd.f32 1e-05, %v2429_v17 }
 0x987   :  { %v2430_v15 = vadd.f32 1e-05, %v2428_v39 }
 0x988   :  { %3026 = vrsqrt.f32 %v2431_v40 }
 0x989   :  { %3028 = vrsqrt.f32 %v2430_v15 }
 0x992   :  { %v3027_v19 = vpop.eup %3026 }
 0x993   :  { %v3029_v43 = vpop.eup %3028  ;;  %v2435_v29 = vmul.f32 %v3027_v19, %v2419_v12 }
 0x994   :  { %v2434_v21 = vmul.f32 %v3029_v43, %v2418_v33 }
 0x995   :  { %v2444_v47 = vmul.f32 %v2536_v24, %v2435_v29 }
 0x996   :  { %v2443_v50 = vmul.f32 %v2536_v24, %v2434_v21 }
 0x997   :  { %v2453_v28 = vadd.f32 %v2537_v46, %v2444_v47 }
 0x998   :  { %v2452_v52 = vadd.f32 %v2537_v46, %v2443_v50 }
 0x999   :  { %2455 = vst.msk [vmem:[#allocation2 + $0x8] sm:$0xff] %vm67_vm1, %v2453_v28 }
 0x99a   :  { %2454 = vst.msk [vmem:[#allocation2] sm:$0xff] %vm67_vm1, %v2452_v52 }
 0x99b   :  { %3043 = shalt.err (!%p3040_p4)
}
 0x99c   :  { %s3044_s2 = scalar_lea.hbm %s3859_s16, 256 }
 0x99d   :  { %p3045_p5 = scmp.ne.s32.totalorder %s3859_s16, %s3044_s2  ;;  %p3048_p6 = scmp.lt.u32.totalorder %s3044_s2, %s3859_s16 }
 0x99f   :  { %p3050_p7 = pnand %p3048_p6, %p3045_p5 }
 0x9a1   :  { %3053 = shalt.err (!%p3050_p7)
}
 0x9a2   :  { %s3074_s30 = smov 128  }
 0x9a3   :  { %2467 = dma.vmem_to_hbm [thread:$0]  %s2462_s27, 256, %s3859_s16, [#allocation3], %s3074_s30, %s3074_s30, %s3065_s23  }
 0x9a4   :  { %3054 = dma.done.wait [#allocation3], 256  }
 0x9a5   :  { %3055 = vsyncadd [#allocation3], 4294967040 }
 0x9a6   :  { %2471 = vsyncpa [#allocation3], 1 }

</bundles_post_ra>
